<compile_context>
chip_gen: v5e
topology: v5e:2x2
jax: 0.10.0
libtpu: 0.0.40
codegen_flags: <defaults>
</compile_context>

<pallas_src>
import functools

import jax
import jax.numpy as jnp
from jax.experimental import pallas as pl
from jax.experimental.pallas import tpu as pltpu

EPS = 1e-5
NEG_SLOPE = 0.01  # nn.LeakyReLU default


def down_kernel(x_ref, w1_ref, s1_ref, b1_ref, w2_ref, s2_ref, b2_ref, o_ref,
                *, H, W):
    # x_ref : (NB, Cin, H*W)  batch group, per-image spatial already flat on lanes
    # w1_ref: (Cmid, 9*Cin)  bf16, column = (ky*3+kx)*Cin + ci
    # w2_ref: (Cout, 9*Cmid) bf16
    # s*/b* : (C, 1) f32 folded BN scale / (conv-bias + BN) bias
    # o_ref : (Cout, NB*S) f32, S = Hp*Wp, lanes ordered (n, hp, wp)
    NB, Cin, HW = x_ref.shape
    Hp, Wp = H // 2, W // 2
    S = Hp * Wp
    L0 = NB * HW      # un-pooled flat lane count, order (n, h, w)
    L = NB * S        # pooled    flat lane count, order (n, hp, wp)
    f32 = jnp.float32

    # ---- 1) put the whole batch group on the lane axis: (Cin, NB*H*W) ----
    xf = jnp.concatenate([x_ref[i] for i in range(NB)], axis=-1)

    # ---- 2) flat-lane index patterns (f32 arithmetic: exact for these
    #         power-of-two sizes; avoids vector integer div) ----
    jj = jax.lax.broadcasted_iota(jnp.int32, (1, L), 1).astype(f32)
    n_j = jnp.floor(jj / S)
    r_j = jj - n_j * S
    hp_j = jnp.floor(r_j / Wp)
    wp_j = r_j - hp_j * Wp

    # ---- 3) 2x2 max-pool fused with the flatten: four exact one-hot gather
    #         matmuls (MXU) + three maxes (VPU, f32). Output is already in the
    #         flat (Cin, L) conv layout -> no sublane->lane relayout needed. ----
    ii = jax.lax.broadcasted_iota(jnp.int32, (L0, 1), 0).astype(f32)
    base = n_j * HW + (2.0 * hp_j) * W + 2.0 * wp_j            # (1, L)

    def gather_flat(off):
        sel = (ii == base + off).astype(f32)                   # (L0, L) one-hot
        return jnp.dot(xf, sel, preferred_element_type=f32)    # (Cin, L)

    pooled = jnp.maximum(
        jnp.maximum(gather_flat(0.0), gather_flat(1.0)),
        jnp.maximum(gather_flat(float(W)), gather_flat(float(W + 1))))

    # ---- 4) boundary "keep" masks (zero padding) for roll-based im2col ----
    one = jnp.ones((1, L), f32)
    row_keep = {-1: (hp_j >= 1).astype(f32), 0: one,
                1: (hp_j <= Hp - 2).astype(f32)}
    col_keep = {-1: (wp_j >= 1).astype(f32), 0: one,
                1: (wp_j <= Wp - 2).astype(f32)}
    tap_shifts, tap_masks = [], []
    for dy in (-1, 0, 1):
        for dx in (-1, 0, 1):
            tap_shifts.append((-(dy * Wp + dx)) % L)
            if dy == 0 and dx == 0:
                tap_masks.append(None)
            elif dy == 0:
                tap_masks.append(col_keep[dx])
            elif dx == 0:
                tap_masks.append(row_keep[dy])
            else:
                tap_masks.append(row_keep[dy] * col_keep[dx])

    def conv3x3_bn_lrelu(act, w_ref, s_ref, b_ref):
        # act: (C, L) f32, lanes = (n, hp, wp).
        # Taps via XLU roll + masks, one fused im2col matmul with bf16
        # operands (f32 accumulate), then folded-BN + LeakyReLU in f32.
        taps = []
        for shift, m in zip(tap_shifts, tap_masks):
            sh = act if shift == 0 else pltpu.roll(act, shift=shift, axis=1)
            if m is not None:
                sh = sh * m
            taps.append(sh)
        patches = jnp.concatenate(taps, axis=0).astype(jnp.bfloat16)   # (9C, L)
        acc = jnp.dot(w_ref[...], patches,
                      preferred_element_type=f32)                      # (Cnext, L)
        y = acc * s_ref[...] + b_ref[...]
        return jnp.where(y >= 0, y, NEG_SLOPE * y)

    h1 = conv3x3_bn_lrelu(pooled, w1_ref, s1_ref, b1_ref)   # (Cmid, L)
    h2 = conv3x3_bn_lrelu(h1, w2_ref, s2_ref, b2_ref)       # (Cout, L)

    o_ref[...] = h2.astype(o_ref.dtype)                     # 128-lane-dense store


def down_pallas(x_nchw, w1_flat, s1, b1, w2_flat, s2, b2):
    """x_nchw: (N, Cin, H, W) f32 -> (N, Cout, H/2, W/2) f32.

    w*_flat are bf16 (Cnext, 9*Cprev) with column = (ky*3+kx)*Cprev + ci;
    s*/b* are f32 (C, 1) folded eval-mode BN scale / bias.
    """
    N, Cin, H, W = x_nchw.shape
    assert H % 2 == 0 and W % 2 == 0
    Hp, Wp = H // 2, W // 2
    S = Hp * Wp
    HW = H * W
    Cmid = w1_flat.shape[0]
    Cout = w2_flat.shape[0]

    # Images per grid step: enough to make the lane axis >= 128 (lane-dense
    # matmuls and output stores); fall back to the whole batch otherwise.
    nb_target = max(1, -(-128 // S))
    if N % nb_target == 0 and (nb_target * S) % 128 == 0:
        NB = nb_target
    else:
        NB = N
    G = N // NB
    L = NB * S

    x3 = x_nchw.reshape(N, Cin, HW)   # free reshape (no transpose, no HBM pass)

    kernel = functools.partial(down_kernel, H=H, W=W)

    out_flat = pl.pallas_call(
        kernel,
        out_shape=jax.ShapeDtypeStruct((Cout, N * S), x_nchw.dtype),
        grid_spec=pltpu.PrefetchScalarGridSpec(
            num_scalar_prefetch=0,
            grid=(G,),
            in_specs=[
                pl.BlockSpec((NB, Cin, HW), lambda g: (g, 0, 0)),
                pl.BlockSpec((Cmid, 9 * Cin), lambda g: (0, 0)),
                pl.BlockSpec((Cmid, 1), lambda g: (0, 0)),
                pl.BlockSpec((Cmid, 1), lambda g: (0, 0)),
                pl.BlockSpec((Cout, 9 * Cmid), lambda g: (0, 0)),
                pl.BlockSpec((Cout, 1), lambda g: (0, 0)),
                pl.BlockSpec((Cout, 1), lambda g: (0, 0)),
            ],
            out_specs=pl.BlockSpec((Cout, L), lambda g: (0, g)),
        ),
        compiler_params=pltpu.CompilerParams(
            dimension_semantics=("parallel",)),
    )(x3, w1_flat, s1, b1, w2_flat, s2, b2)

    # Tiny wrapper-side layout plumbing so the kernel's store stays lane-dense.
    return jnp.transpose(out_flat.reshape(Cout, N, Hp, Wp), (1, 0, 2, 3))


# ------------------------- pure-JAX reference (NCHW) -------------------------
def down_ref(x, w1, b1c, g1, be1, m1, v1, w2, b2c, g2, be2, m2, v2):
    def bn(y, g, be, m, v):
        return ((y - m[None, :, None, None]) /
                jnp.sqrt(v + EPS)[None, :, None, None] *
                g[None, :, None, None] + be[None, :, None, None])

    def lrelu(y):
        return jnp.where(y >= 0, y, NEG_SLOPE * y)

    p = jax.lax.reduce_window(x, -jnp.inf, jax.lax.max,
                              (1, 1, 2, 2), (1, 1, 2, 2), "VALID")
    y = jax.lax.conv_general_dilated(
        p, w1, (1, 1), ((1, 1), (1, 1)),
        dimension_numbers=("NCHW", "OIHW", "NCHW"),
        precision=jax.lax.Precision.HIGHEST) + b1c[None, :, None, None]
    y = lrelu(bn(y, g1, be1, m1, v1))
    y = jax.lax.conv_general_dilated(
        y, w2, (1, 1), ((1, 1), (1, 1)),
        dimension_numbers=("NCHW", "OIHW", "NCHW"),
        precision=jax.lax.Precision.HIGHEST) + b2c[None, :, None, None]
    y = lrelu(bn(y, g2, be2, m2, v2))
    return y


if __name__ == "__main__":
    N, Cin, H, W = 2, 4, 16, 16
    Cout = 8
    Cmid = Cout  # DoubleConv default: mid_channels = out_channels

    keys = jax.random.split(jax.random.PRNGKey(0), 13)
    f32 = jnp.float32

    # Deterministic synthetic parameters (PyTorch param shapes).
    w1 = 0.1 * jax.random.normal(keys[0], (Cmid, Cin, 3, 3), f32)   # Conv2d.weight (OIHW)
    b1c = 0.1 * jax.random.normal(keys[1], (Cmid,), f32)            # Conv2d.bias
    g1 = 1.0 + 0.1 * jax.random.normal(keys[2], (Cmid,), f32)       # BN.weight
    be1 = 0.1 * jax.random.normal(keys[3], (Cmid,), f32)            # BN.bias
    m1 = 0.1 * jax.random.normal(keys[4], (Cmid,), f32)             # BN.running_mean
    v1 = 1.0 + 0.1 * jnp.abs(jax.random.normal(keys[5], (Cmid,), f32))  # BN.running_var

    w2 = 0.1 * jax.random.normal(keys[6], (Cout, Cmid, 3, 3), f32)
    b2c = 0.1 * jax.random.normal(keys[7], (Cout,), f32)
    g2 = 1.0 + 0.1 * jax.random.normal(keys[8], (Cout,), f32)
    be2 = 0.1 * jax.random.normal(keys[9], (Cout,), f32)
    m2 = 0.1 * jax.random.normal(keys[10], (Cout,), f32)
    v2 = 1.0 + 0.1 * jnp.abs(jax.random.normal(keys[11], (Cout,), f32))

    x = jax.random.normal(keys[12], (N, Cin, H, W), f32)

    # Fold conv-bias + eval-mode BN into per-channel scale/bias; rearrange conv
    # weights OIHW -> (Cout, 9*Cin) with column = (ky*3+kx)*Cin + ci, cast to
    # bf16 (MXU operands; accumulation stays f32 in-kernel).
    inv1 = g1 / jnp.sqrt(v1 + EPS)
    s1 = inv1.reshape(Cmid, 1)
    b1 = (be1 + (b1c - m1) * inv1).reshape(Cmid, 1)
    inv2 = g2 / jnp.sqrt(v2 + EPS)
    s2 = inv2.reshape(Cout, 1)
    b2 = (be2 + (b2c - m2) * inv2).reshape(Cout, 1)
    w1_flat = jnp.transpose(w1, (0, 2, 3, 1)).reshape(Cmid, 9 * Cin).astype(jnp.bfloat16)
    w2_flat = jnp.transpose(w2, (0, 2, 3, 1)).reshape(Cout, 9 * Cmid).astype(jnp.bfloat16)

    out = down_pallas(x, w1_flat, s1, b1, w2_flat, s2, b2)
    out = jax.block_until_ready(out)

    ref = down_ref(x, w1, b1c, g1, be1, m1, v1, w2, b2c, g2, be2, m2, v2)
    ref = jax.block_until_ready(ref)

    assert out.shape == (N, Cout, H // 2, W // 2), out.shape
    max_err = float(jnp.max(jnp.abs(out - ref)))
    # bf16 MXU operands (review-requested) vs an f32 HIGHEST-precision
    # reference: expected max abs error a few 1e-3.
    assert max_err < 3e-2, f"max abs error {max_err}"

    print("KERNEL_OK")
</pallas_src>

<mosaic_0001>
module attributes {stable_mosaic.version = 11 : i64} {
  func.func @down_kernel(%arg0: i32, %arg1: memref<2x4x256xf32, #tpu.memory_space<vmem>>, %arg2: memref<8x36xbf16, #tpu.memory_space<vmem>>, %arg3: memref<8x1xf32, #tpu.memory_space<vmem>>, %arg4: memref<8x1xf32, #tpu.memory_space<vmem>>, %arg5: memref<8x72xbf16, #tpu.memory_space<vmem>>, %arg6: memref<8x1xf32, #tpu.memory_space<vmem>>, %arg7: memref<8x1xf32, #tpu.memory_space<vmem>>, %arg8: memref<8x128xf32, #tpu.memory_space<vmem>>) attributes {dimension_semantics = [#tpu.dimension_semantics<parallel>], iteration_bounds = array<i64: 1>, scalar_prefetch = 0 : i64, scratch_operands = 0 : i64, tpu.core_type = #tpu.core_type<tc>, window_params = [{transform_indices = @transform_0, window_bounds = array<i64: 2, 4, 256>}, {pipeline_mode = #tpu.pipeline_mode<synchronous>, transform_indices = @transform_1, window_bounds = array<i64: 8, 36>}, {pipeline_mode = #tpu.pipeline_mode<synchronous>, transform_indices = @transform_2, window_bounds = array<i64: 8, 1>}, {pipeline_mode = #tpu.pipeline_mode<synchronous>, transform_indices = @transform_3, window_bounds = array<i64: 8, 1>}, {pipeline_mode = #tpu.pipeline_mode<synchronous>, transform_indices = @transform_4, window_bounds = array<i64: 8, 72>}, {pipeline_mode = #tpu.pipeline_mode<synchronous>, transform_indices = @transform_5, window_bounds = array<i64: 8, 1>}, {pipeline_mode = #tpu.pipeline_mode<synchronous>, transform_indices = @transform_6, window_bounds = array<i64: 8, 1>}, {transform_indices = @transform_7, window_bounds = array<i64: 8, 128>}]} {
    %c0 = arith.constant 0 : index
    %c0_0 = arith.constant 0 : index
    %c0_1 = arith.constant 0 : index
    %0 = vector.load %arg1[%c0, %c0_0, %c0_1] : memref<2x4x256xf32, #tpu.memory_space<vmem>>, vector<1x4x256xf32>
    %1 = vector.shape_cast %0 : vector<1x4x256xf32> to vector<4x256xf32>
    %c1 = arith.constant 1 : index
    %c0_2 = arith.constant 0 : index
    %c0_3 = arith.constant 0 : index
    %2 = vector.load %arg1[%c1, %c0_2, %c0_3] : memref<2x4x256xf32, #tpu.memory_space<vmem>>, vector<1x4x256xf32>
    %3 = vector.shape_cast %2 : vector<1x4x256xf32> to vector<4x256xf32>
    %4 = tpu.concatenate %1, %3 in 1 : vector<4x256xf32>, vector<4x256xf32> -> vector<4x512xf32>
    %5 = tpu.iota {dimensions = array<i32: 1>} : vector<1x128xi32>
    %6 = arith.sitofp %5 : vector<1x128xi32> to vector<1x128xf32>
    %cst = arith.constant 6.400000e+01 : f32
    %7 = vector.broadcast %cst : f32 to vector<1x128xf32>
    %8 = arith.divf %6, %7 : vector<1x128xf32>
    %9 = math.floor %8 : vector<1x128xf32>
    %cst_4 = arith.constant 6.400000e+01 : f32
    %10 = vector.broadcast %cst_4 : f32 to vector<1x128xf32>
    %11 = arith.mulf %9, %10 : vector<1x128xf32>
    %12 = arith.subf %6, %11 : vector<1x128xf32>
    %cst_5 = arith.constant 8.000000e+00 : f32
    %13 = vector.broadcast %cst_5 : f32 to vector<1x128xf32>
    %14 = arith.divf %12, %13 : vector<1x128xf32>
    %15 = math.floor %14 : vector<1x128xf32>
    %cst_6 = arith.constant 8.000000e+00 : f32
    %16 = vector.broadcast %cst_6 : f32 to vector<1x128xf32>
    %17 = arith.mulf %15, %16 : vector<1x128xf32>
    %18 = arith.subf %12, %17 : vector<1x128xf32>
    %19 = tpu.iota {dimensions = array<i32: 0>} : vector<512x1xi32>
    %20 = arith.sitofp %19 : vector<512x1xi32> to vector<512x1xf32>
    %cst_7 = arith.constant 2.560000e+02 : f32
    %21 = vector.broadcast %cst_7 : f32 to vector<1x128xf32>
    %22 = arith.mulf %9, %21 : vector<1x128xf32>
    %cst_8 = arith.constant 2.000000e+00 : f32
    %23 = vector.broadcast %cst_8 : f32 to vector<1x128xf32>
    %24 = arith.mulf %23, %15 : vector<1x128xf32>
    %cst_9 = arith.constant 1.600000e+01 : f32
    %25 = vector.broadcast %cst_9 : f32 to vector<1x128xf32>
    %26 = arith.mulf %24, %25 : vector<1x128xf32>
    %27 = arith.addf %22, %26 : vector<1x128xf32>
    %cst_10 = arith.constant 2.000000e+00 : f32
    %28 = vector.broadcast %cst_10 : f32 to vector<1x128xf32>
    %29 = arith.mulf %28, %18 : vector<1x128xf32>
    %30 = arith.addf %27, %29 : vector<1x128xf32>
    %cst_11 = arith.constant 0.000000e+00 : f32
    %31 = vector.broadcast %cst_11 : f32 to vector<1x128xf32>
    %32 = arith.addf %30, %31 : vector<1x128xf32>
    %33 = vector.broadcast %20 : vector<512x1xf32> to vector<512x128xf32>
    %34 = vector.broadcast %32 : vector<1x128xf32> to vector<512x128xf32>
    %35 = arith.cmpf oeq, %33, %34 : vector<512x128xf32>
    %36 = arith.extui %35 : vector<512x128xi1> to vector<512x128xi32>
    %37 = arith.sitofp %36 : vector<512x128xi32> to vector<512x128xf32>
    %cst_12 = arith.constant dense<0.000000e+00> : vector<4x128xf32>
    %38 = tpu.matmul %4, %37, %cst_12 {dimension_numbers = #tpu.dot_dimension_numbers<[1], [0], [0], [1], [0, 0, 1, 1], [], []>} : vector<4x512xf32>, vector<512x128xf32>, vector<4x128xf32> -> vector<4x128xf32>
    %cst_13 = arith.constant 1.000000e+00 : f32
    %39 = vector.broadcast %cst_13 : f32 to vector<1x128xf32>
    %40 = arith.addf %30, %39 : vector<1x128xf32>
    %41 = vector.broadcast %20 : vector<512x1xf32> to vector<512x128xf32>
    %42 = vector.broadcast %40 : vector<1x128xf32> to vector<512x128xf32>
    %43 = arith.cmpf oeq, %41, %42 : vector<512x128xf32>
    %44 = arith.extui %43 : vector<512x128xi1> to vector<512x128xi32>
    %45 = arith.sitofp %44 : vector<512x128xi32> to vector<512x128xf32>
    %cst_14 = arith.constant dense<0.000000e+00> : vector<4x128xf32>
    %46 = tpu.matmul %4, %45, %cst_14 {dimension_numbers = #tpu.dot_dimension_numbers<[1], [0], [0], [1], [0, 0, 1, 1], [], []>} : vector<4x512xf32>, vector<512x128xf32>, vector<4x128xf32> -> vector<4x128xf32>
    %47 = arith.maximumf %38, %46 : vector<4x128xf32>
    %cst_15 = arith.constant 1.600000e+01 : f32
    %48 = vector.broadcast %cst_15 : f32 to vector<1x128xf32>
    %49 = arith.addf %30, %48 : vector<1x128xf32>
    %50 = vector.broadcast %20 : vector<512x1xf32> to vector<512x128xf32>
    %51 = vector.broadcast %49 : vector<1x128xf32> to vector<512x128xf32>
    %52 = arith.cmpf oeq, %50, %51 : vector<512x128xf32>
    %53 = arith.extui %52 : vector<512x128xi1> to vector<512x128xi32>
    %54 = arith.sitofp %53 : vector<512x128xi32> to vector<512x128xf32>
    %cst_16 = arith.constant dense<0.000000e+00> : vector<4x128xf32>
    %55 = tpu.matmul %4, %54, %cst_16 {dimension_numbers = #tpu.dot_dimension_numbers<[1], [0], [0], [1], [0, 0, 1, 1], [], []>} : vector<4x512xf32>, vector<512x128xf32>, vector<4x128xf32> -> vector<4x128xf32>
    %cst_17 = arith.constant 1.700000e+01 : f32
    %56 = vector.broadcast %cst_17 : f32 to vector<1x128xf32>
    %57 = arith.addf %30, %56 : vector<1x128xf32>
    %58 = vector.broadcast %20 : vector<512x1xf32> to vector<512x128xf32>
    %59 = vector.broadcast %57 : vector<1x128xf32> to vector<512x128xf32>
    %60 = arith.cmpf oeq, %58, %59 : vector<512x128xf32>
    %61 = arith.extui %60 : vector<512x128xi1> to vector<512x128xi32>
    %62 = arith.sitofp %61 : vector<512x128xi32> to vector<512x128xf32>
    %cst_18 = arith.constant dense<0.000000e+00> : vector<4x128xf32>
    %63 = tpu.matmul %4, %62, %cst_18 {dimension_numbers = #tpu.dot_dimension_numbers<[1], [0], [0], [1], [0, 0, 1, 1], [], []>} : vector<4x512xf32>, vector<512x128xf32>, vector<4x128xf32> -> vector<4x128xf32>
    %64 = arith.maximumf %55, %63 : vector<4x128xf32>
    %65 = arith.maximumf %47, %64 : vector<4x128xf32>
    %cst_19 = arith.constant 1.000000e+00 : f32
    %66 = vector.broadcast %cst_19 : f32 to vector<1x128xf32>
    %67 = arith.cmpf oge, %15, %66 : vector<1x128xf32>
    %68 = arith.extui %67 : vector<1x128xi1> to vector<1x128xi32>
    %69 = arith.sitofp %68 : vector<1x128xi32> to vector<1x128xf32>
    %cst_20 = arith.constant 6.000000e+00 : f32
    %70 = vector.broadcast %cst_20 : f32 to vector<1x128xf32>
    %71 = arith.cmpf ole, %15, %70 : vector<1x128xf32>
    %72 = arith.extui %71 : vector<1x128xi1> to vector<1x128xi32>
    %73 = arith.sitofp %72 : vector<1x128xi32> to vector<1x128xf32>
    %cst_21 = arith.constant 1.000000e+00 : f32
    %74 = vector.broadcast %cst_21 : f32 to vector<1x128xf32>
    %75 = arith.cmpf oge, %18, %74 : vector<1x128xf32>
    %76 = arith.extui %75 : vector<1x128xi1> to vector<1x128xi32>
    %77 = arith.sitofp %76 : vector<1x128xi32> to vector<1x128xf32>
    %cst_22 = arith.constant 6.000000e+00 : f32
    %78 = vector.broadcast %cst_22 : f32 to vector<1x128xf32>
    %79 = arith.cmpf ole, %18, %78 : vector<1x128xf32>
    %80 = arith.extui %79 : vector<1x128xi1> to vector<1x128xi32>
    %81 = arith.sitofp %80 : vector<1x128xi32> to vector<1x128xf32>
    %82 = arith.mulf %69, %77 : vector<1x128xf32>
    %83 = arith.mulf %69, %81 : vector<1x128xf32>
    %84 = arith.mulf %73, %77 : vector<1x128xf32>
    %85 = arith.mulf %73, %81 : vector<1x128xf32>
    %c9_i32 = arith.constant 9 : i32
    %86 = tpu.dynamic_rotate %65 by %c9_i32 dim 1 : vector<4x128xf32>, i32 -> vector<4x128xf32>
    %87 = vector.broadcast %82 : vector<1x128xf32> to vector<4x128xf32>
    %88 = arith.mulf %86, %87 : vector<4x128xf32>
    %c8_i32 = arith.constant 8 : i32
    %89 = tpu.dynamic_rotate %65 by %c8_i32 dim 1 : vector<4x128xf32>, i32 -> vector<4x128xf32>
    %90 = vector.broadcast %69 : vector<1x128xf32> to vector<4x128xf32>
    %91 = arith.mulf %89, %90 : vector<4x128xf32>
    %c7_i32 = arith.constant 7 : i32
    %92 = tpu.dynamic_rotate %65 by %c7_i32 dim 1 : vector<4x128xf32>, i32 -> vector<4x128xf32>
    %93 = vector.broadcast %83 : vector<1x128xf32> to vector<4x128xf32>
    %94 = arith.mulf %92, %93 : vector<4x128xf32>
    %c1_i32 = arith.constant 1 : i32
    %95 = tpu.dynamic_rotate %65 by %c1_i32 dim 1 : vector<4x128xf32>, i32 -> vector<4x128xf32>
    %96 = vector.broadcast %77 : vector<1x128xf32> to vector<4x128xf32>
    %97 = arith.mulf %95, %96 : vector<4x128xf32>
    %c127_i32 = arith.constant 127 : i32
    %98 = tpu.dynamic_rotate %65 by %c127_i32 dim 1 : vector<4x128xf32>, i32 -> vector<4x128xf32>
    %99 = vector.broadcast %81 : vector<1x128xf32> to vector<4x128xf32>
    %100 = arith.mulf %98, %99 : vector<4x128xf32>
    %c121_i32 = arith.constant 121 : i32
    %101 = tpu.dynamic_rotate %65 by %c121_i32 dim 1 : vector<4x128xf32>, i32 -> vector<4x128xf32>
    %102 = vector.broadcast %84 : vector<1x128xf32> to vector<4x128xf32>
    %103 = arith.mulf %101, %102 : vector<4x128xf32>
    %c120_i32 = arith.constant 120 : i32
    %104 = tpu.dynamic_rotate %65 by %c120_i32 dim 1 : vector<4x128xf32>, i32 -> vector<4x128xf32>
    %105 = vector.broadcast %73 : vector<1x128xf32> to vector<4x128xf32>
    %106 = arith.mulf %104, %105 : vector<4x128xf32>
    %c119_i32 = arith.constant 119 : i32
    %107 = tpu.dynamic_rotate %65 by %c119_i32 dim 1 : vector<4x128xf32>, i32 -> vector<4x128xf32>
    %108 = vector.broadcast %85 : vector<1x128xf32> to vector<4x128xf32>
    %109 = arith.mulf %107, %108 : vector<4x128xf32>
    %110 = tpu.concatenate %88, %91, %94, %97, %65, %100, %103, %106, %109 in 0 : vector<4x128xf32>, vector<4x128xf32>, vector<4x128xf32>, vector<4x128xf32>, vector<4x128xf32>, vector<4x128xf32>, vector<4x128xf32>, vector<4x128xf32>, vector<4x128xf32> -> vector<36x128xf32>
    %111 = arith.truncf %110 : vector<36x128xf32> to vector<36x128xbf16>
    %c0_23 = arith.constant 0 : index
    %c0_24 = arith.constant 0 : index
    %112 = vector.load %arg2[%c0_23, %c0_24] : memref<8x36xbf16, #tpu.memory_space<vmem>>, vector<8x36xbf16>
    %cst_25 = arith.constant dense<0.000000e+00> : vector<8x128xf32>
    %113 = tpu.matmul %112, %111, %cst_25 {dimension_numbers = #tpu.dot_dimension_numbers<[1], [0], [0], [1], [0, 0, 1, 1], [], []>} : vector<8x36xbf16>, vector<36x128xbf16>, vector<8x128xf32> -> vector<8x128xf32>
    %c0_26 = arith.constant 0 : index
    %c0_27 = arith.constant 0 : index
    %114 = vector.load %arg3[%c0_26, %c0_27] : memref<8x1xf32, #tpu.memory_space<vmem>>, vector<8x1xf32>
    %115 = vector.broadcast %114 : vector<8x1xf32> to vector<8x128xf32>
    %116 = arith.mulf %113, %115 : vector<8x128xf32>
    %c0_28 = arith.constant 0 : index
    %c0_29 = arith.constant 0 : index
    %117 = vector.load %arg4[%c0_28, %c0_29] : memref<8x1xf32, #tpu.memory_space<vmem>>, vector<8x1xf32>
    %118 = vector.broadcast %117 : vector<8x1xf32> to vector<8x128xf32>
    %119 = arith.addf %116, %118 : vector<8x128xf32>
    %cst_30 = arith.constant 0.000000e+00 : f32
    %120 = vector.broadcast %cst_30 : f32 to vector<8x128xf32>
    %121 = arith.cmpf oge, %119, %120 : vector<8x128xf32>
    %cst_31 = arith.constant 0.00999999977 : f32
    %122 = vector.broadcast %cst_31 : f32 to vector<8x128xf32>
    %123 = arith.mulf %122, %119 : vector<8x128xf32>
    %124 = arith.select %121, %119, %123 : vector<8x128xi1>, vector<8x128xf32>
    %c9_i32_32 = arith.constant 9 : i32
    %125 = tpu.dynamic_rotate %124 by %c9_i32_32 dim 1 : vector<8x128xf32>, i32 -> vector<8x128xf32>
    %126 = vector.broadcast %82 : vector<1x128xf32> to vector<8x128xf32>
    %127 = arith.mulf %125, %126 : vector<8x128xf32>
    %c8_i32_33 = arith.constant 8 : i32
    %128 = tpu.dynamic_rotate %124 by %c8_i32_33 dim 1 : vector<8x128xf32>, i32 -> vector<8x128xf32>
    %129 = vector.broadcast %69 : vector<1x128xf32> to vector<8x128xf32>
    %130 = arith.mulf %128, %129 : vector<8x128xf32>
    %c7_i32_34 = arith.constant 7 : i32
    %131 = tpu.dynamic_rotate %124 by %c7_i32_34 dim 1 : vector<8x128xf32>, i32 -> vector<8x128xf32>
    %132 = vector.broadcast %83 : vector<1x128xf32> to vector<8x128xf32>
    %133 = arith.mulf %131, %132 : vector<8x128xf32>
    %c1_i32_35 = arith.constant 1 : i32
    %134 = tpu.dynamic_rotate %124 by %c1_i32_35 dim 1 : vector<8x128xf32>, i32 -> vector<8x128xf32>
    %135 = vector.broadcast %77 : vector<1x128xf32> to vector<8x128xf32>
    %136 = arith.mulf %134, %135 : vector<8x128xf32>
    %c127_i32_36 = arith.constant 127 : i32
    %137 = tpu.dynamic_rotate %124 by %c127_i32_36 dim 1 : vector<8x128xf32>, i32 -> vector<8x128xf32>
    %138 = vector.broadcast %81 : vector<1x128xf32> to vector<8x128xf32>
    %139 = arith.mulf %137, %138 : vector<8x128xf32>
    %c121_i32_37 = arith.constant 121 : i32
    %140 = tpu.dynamic_rotate %124 by %c121_i32_37 dim 1 : vector<8x128xf32>, i32 -> vector<8x128xf32>
    %141 = vector.broadcast %84 : vector<1x128xf32> to vector<8x128xf32>
    %142 = arith.mulf %140, %141 : vector<8x128xf32>
    %c120_i32_38 = arith.constant 120 : i32
    %143 = tpu.dynamic_rotate %124 by %c120_i32_38 dim 1 : vector<8x128xf32>, i32 -> vector<8x128xf32>
    %144 = vector.broadcast %73 : vector<1x128xf32> to vector<8x128xf32>
    %145 = arith.mulf %143, %144 : vector<8x128xf32>
    %c119_i32_39 = arith.constant 119 : i32
    %146 = tpu.dynamic_rotate %124 by %c119_i32_39 dim 1 : vector<8x128xf32>, i32 -> vector<8x128xf32>
    %147 = vector.broadcast %85 : vector<1x128xf32> to vector<8x128xf32>
    %148 = arith.mulf %146, %147 : vector<8x128xf32>
    %149 = tpu.concatenate %127, %130, %133, %136, %124, %139, %142, %145, %148 in 0 : vector<8x128xf32>, vector<8x128xf32>, vector<8x128xf32>, vector<8x128xf32>, vector<8x128xf32>, vector<8x128xf32>, vector<8x128xf32>, vector<8x128xf32>, vector<8x128xf32> -> vector<72x128xf32>
    %150 = arith.truncf %149 : vector<72x128xf32> to vector<72x128xbf16>
    %c0_40 = arith.constant 0 : index
    %c0_41 = arith.constant 0 : index
    %151 = vector.load %arg5[%c0_40, %c0_41] : memref<8x72xbf16, #tpu.memory_space<vmem>>, vector<8x72xbf16>
    %cst_42 = arith.constant dense<0.000000e+00> : vector<8x128xf32>
    %152 = tpu.matmul %151, %150, %cst_42 {dimension_numbers = #tpu.dot_dimension_numbers<[1], [0], [0], [1], [0, 0, 1, 1], [], []>} : vector<8x72xbf16>, vector<72x128xbf16>, vector<8x128xf32> -> vector<8x128xf32>
    %c0_43 = arith.constant 0 : index
    %c0_44 = arith.constant 0 : index
    %153 = vector.load %arg6[%c0_43, %c0_44] : memref<8x1xf32, #tpu.memory_space<vmem>>, vector<8x1xf32>
    %154 = vector.broadcast %153 : vector<8x1xf32> to vector<8x128xf32>
    %155 = arith.mulf %152, %154 : vector<8x128xf32>
    %c0_45 = arith.constant 0 : index
    %c0_46 = arith.constant 0 : index
    %156 = vector.load %arg7[%c0_45, %c0_46] : memref<8x1xf32, #tpu.memory_space<vmem>>, vector<8x1xf32>
    %157 = vector.broadcast %156 : vector<8x1xf32> to vector<8x128xf32>
    %158 = arith.addf %155, %157 : vector<8x128xf32>
    %cst_47 = arith.constant 0.000000e+00 : f32
    %159 = vector.broadcast %cst_47 : f32 to vector<8x128xf32>
    %160 = arith.cmpf oge, %158, %159 : vector<8x128xf32>
    %cst_48 = arith.constant 0.00999999977 : f32
    %161 = vector.broadcast %cst_48 : f32 to vector<8x128xf32>
    %162 = arith.mulf %161, %158 : vector<8x128xf32>
    %163 = arith.select %160, %158, %162 : vector<8x128xi1>, vector<8x128xf32>
    %c0_49 = arith.constant 0 : index
    %c0_50 = arith.constant 0 : index
    %164 = vector.load %arg8[%c0_49, %c0_50] : memref<8x128xf32, #tpu.memory_space<vmem>>, vector<8x128xf32>
    tpu.vector_store %arg8[%c0_49, %c0_50], %163 {strides = array<i32>} : memref<8x128xf32, #tpu.memory_space<vmem>>, vector<8x128xf32>,
    return
  }
  func.func @transform_0(%arg0: i32) -> (i32, i32, i32) {
    %c0_i32 = arith.constant 0 : i32
    %c0_i32_0 = arith.constant 0 : i32
    %c0_i32_1 = arith.constant 0 : i32
    return %arg0, %c0_i32, %c0_i32_0 : i32, i32, i32
  }
  func.func @transform_1(%arg0: i32) -> (i32, i32) {
    %c0_i32 = arith.constant 0 : i32
    %c0_i32_0 = arith.constant 0 : i32
    %c0_i32_1 = arith.constant 0 : i32
    return %c0_i32, %c0_i32_0 : i32, i32
  }
  func.func @transform_2(%arg0: i32) -> (i32, i32) {
    %c0_i32 = arith.constant 0 : i32
    %c0_i32_0 = arith.constant 0 : i32
    %c0_i32_1 = arith.constant 0 : i32
    return %c0_i32, %c0_i32_0 : i32, i32
  }
  func.func @transform_3(%arg0: i32) -> (i32, i32) {
    %c0_i32 = arith.constant 0 : i32
    %c0_i32_0 = arith.constant 0 : i32
    %c0_i32_1 = arith.constant 0 : i32
    return %c0_i32, %c0_i32_0 : i32, i32
  }
  func.func @transform_4(%arg0: i32) -> (i32, i32) {
    %c0_i32 = arith.constant 0 : i32
    %c0_i32_0 = arith.constant 0 : i32
    %c0_i32_1 = arith.constant 0 : i32
    return %c0_i32, %c0_i32_0 : i32, i32
  }
  func.func @transform_5(%arg0: i32) -> (i32, i32) {
    %c0_i32 = arith.constant 0 : i32
    %c0_i32_0 = arith.constant 0 : i32
    %c0_i32_1 = arith.constant 0 : i32
    return %c0_i32, %c0_i32_0 : i32, i32
  }
  func.func @transform_6(%arg0: i32) -> (i32, i32) {
    %c0_i32 = arith.constant 0 : i32
    %c0_i32_0 = arith.constant 0 : i32
    %c0_i32_1 = arith.constant 0 : i32
    return %c0_i32, %c0_i32_0 : i32, i32
  }
  func.func @transform_7(%arg0: i32) -> (i32, i32) {
    %c0_i32 = arith.constant 0 : i32
    %c0_i32_0 = arith.constant 0 : i32
    return %c0_i32, %arg0 : i32, i32
  }
}

</mosaic_0001>

<bundles_post_ra>
// kernel: tpu_custom_call.1
= control target key start
LH: loop header
LB: loop body
LE: loop exit
PB: predicated region body
PF: predicated region fallthrough
CT: control target
= control target key end

     0   :  { %12 = vsyncpa [#allocation3], 0  ;;  %v2047_v0 = vmov 64.0   ;;  %v2048_v1 = vmov 8.0   ;;  %v43_v2 = vlaneseq  ;;  %s2051_s28 = smov 120   ;;  %s2052_s29 = smov 119   ;;  %s3327_s0 = inlined_call_operand.vmem [shape: f32[2,4,256], index: 0, kind: input, shape index: {}]   ;;  %s3328_s1 = inlined_call_operand.vmem [shape: bf16[8,36], index: 1, kind: input, shape index: {}]   ;;  %s3329_s2 = inlined_call_operand.vmem [shape: f32[8,1], index: 2, kind: input, shape index: {}]   ;;  %s3330_s3 = inlined_call_operand.vmem [shape: f32[8,1], index: 3, kind: input, shape index: {}]   ;;  %s3331_s4 = inlined_call_operand.vmem [shape: bf16[8,72], index: 4, kind: input, shape index: {}]   ;;  %s3332_s5 = inlined_call_operand.vmem [shape: f32[8,1], index: 5, kind: input, shape index: {}]   ;;  %s3333_s6 = inlined_call_operand.vmem [shape: f32[8,1], index: 6, kind: input, shape index: {}]   ;;  %s3334_s7 = inlined_call_operand.hbm [shape: f32[8,128], index: 7, kind: output, shape index: {}]  }
   0x1   :  { %2017 = vrcp.f32 %v2047_v0  ;;  %s2053_s30 = smov 1   ;;  %s2054_s8 = smov 121  }
   0x2   :  { %2019 = vrcp.f32 %v2048_v1  ;;  %v2101_v3 = vshrl.u32 %v43_v2, 7  ;;  %v44_v6 = vand.u32 127, %v43_v2  ;;  %s2055_s9 = smov 127   ;;  %s2056_s10 = smov 7  }
   0x3   :  { %s2057_s11 = smov 9   ;;  %s2060_s19 = smov [#allocation2]  }
   0x4   :  { %v116_v10 = vadd.s32 376, %v2101_v3  ;;  %v115_v12 = vadd.s32 368, %v2101_v3  ;;  %v132_v13 = vadd.s32 504, %v2101_v3  ;;  %v45_v14 = vcvt.s32.f32 %v44_v6  ;;  %s1470_s20 = sshll.u32 %s2060_s19, 4  ;;  %s1472_s23 = sshll.u32 %s3334_s7, 4  ;;  %s1471_s20 = int_to_ptr.vmem [resolvable:$true] %s1470_s20  ;;  %s1473_s23 = int_to_ptr.hbm [resolvable:$true] %s1472_s23 }
   0x5   :  { %v84_v16 = vadd.s32 120, %v2101_v3  ;;  %v100_v17 = vadd.s32 248, %v2101_v3  ;;  %v114_v18 = vadd.s32 360, %v2101_v3  ;;  %v131_v19 = vadd.s32 496, %v2101_v3 }
   0x6   :  { %v2110_v22 = vcvt.s32.f32 %v116_v10  ;;  %v83_v23 = vadd.s32 112, %v2101_v3  ;;  %v2113_v24 = vcvt.s32.f32 %v115_v12  ;;  %v2115_v25 = vcvt.s32.f32 %v132_v13 }
   0x7   :  { %v2018_v4 = vpop.eup %2017  ;;  %v99_v26 = vadd.s32 240, %v2101_v3  ;;  %v113_v27 = vadd.s32 352, %v2101_v3  ;;  %v2119_v29 = vcvt.s32.f32 %v84_v16  ;;  %v130_v30 = vadd.s32 488, %v2101_v3 }
   0x8   :  { %v2020_v5 = vpop.eup %2019  ;;  %v47_v7 = vmul.f32 64.0, %v2018_v4  ;;  %vm51_vm0 = vweird.f32 %v2018_v4  ;;  %v82_v31 = vadd.s32 104, %v2101_v3  ;;  %v2123_v33 = vcvt.s32.f32 %v100_v17 }
   0x9   :  { %v58_v8 = vmul.f32 8.0, %v2020_v5  ;;  %v2125_v34 = vcvt.s32.f32 %v114_v18  ;;  %v2127_v35 = vcvt.s32.f32 %v131_v19  ;;  %vm62_vm1 = vweird.f32 %v2020_v5 }
   0xa   :  { %v48_v9 = vsub.f32 1.0, %v47_v7  ;;  %v2129_v37 = vcvt.s32.f32 %v83_v23  ;;  %v98_v38 = vadd.s32 232, %v2101_v3  ;;  %v2132_v40 = vcvt.s32.f32 %v99_v26 }
   0xb   :  { %v59_v11 = vsub.f32 1.0, %v58_v8  ;;  %v2134_v41 = vcvt.s32.f32 %v113_v27  ;;  %v112_v42 = vadd.s32 344, %v2101_v3  ;;  %v2137_v43 = vcvt.s32.f32 %v130_v30 }
   0xc   :  { %v49_v15 = vmul.f32 %v2018_v4, %v48_v9  ;;  %v2139_v44 = vcvt.s32.f32 %v82_v31  ;;  %v129_v45 = vadd.s32 480, %v2101_v3  ;;  %v81_v46 = vadd.s32 96, %v2101_v3 }
   0xd   :  { %v60_v21 = vmul.f32 %v2020_v5, %v59_v11  ;;  %v97_v48 = vadd.s32 224, %v2101_v3  ;;  %v111_v49 = vadd.s32 336, %v2101_v3  ;;  %v128_v50 = vadd.s32 472, %v2101_v3 }
   0xe   :  { %v50_v20 = vadd.f32 %v2018_v4, %v49_v15  ;;  %v2146_v52 = vcvt.s32.f32 %v98_v38  ;;  %v80_v53 = vadd.s32 88, %v2101_v3  ;;  %v96_v54 = vadd.s32 216, %v2101_v3 }
   0xf   :  { %v61_v36 = vadd.f32 %v2020_v5, %v60_v21  ;;  %v110_v56 = vadd.s32 328, %v2101_v3  ;;  %v127_v57 = vadd.s32 464, %v2101_v3  ;;  %v79_v58 = vadd.s32 80, %v2101_v3 }
  0x10   :  { %v52_v28 = vsel %vm51_vm0, %v2018_v4, %v50_v20  ;;  %v2153_v59 = vcvt.s32.f32 %v112_v42  ;;  %v2155_v60 = vcvt.s32.f32 %v129_v45  ;;  %v2157_v61 = vcvt.s32.f32 %v81_v46 }
  0x11   :  { %v53_v32 = vmul.f32 %v52_v28, %v45_v14  ;;  %v63_v51 = vsel %vm62_vm1, %v2020_v5, %v61_v36  ;;  %v95_v62 = vadd.s32 208, %v2101_v3  ;;  %v2160_v0 = vcvt.s32.f32 %v97_v48 }
  0x12   :  { %v2162_v1 = vcvt.s32.f32 %v111_v49  ;;  %v2164_v2 = vcvt.s32.f32 %v128_v50  ;;  %v2166_v4 = vcvt.s32.f32 %v80_v53  ;;  %v2168_v5 = vcvt.s32.f32 %v96_v54 }
  0x13   :  { %v54_v39 = vfloor.f32 %v53_v32  ;;  %v109_v6 = vadd.s32 320, %v2101_v3  ;;  %v126_v7 = vadd.s32 456, %v2101_v3  ;;  %v2174_v9 = vcvt.s32.f32 %v110_v56 }
  0x14   :  { %v2176_v10 = vcvt.s32.f32 %v127_v57  ;;  %v2178_v11 = vcvt.s32.f32 %v79_v58  ;;  %v2180_v13 = vcvt.s32.f32 %v95_v62  ;;  %v94_v15 = vadd.s32 200, %v2101_v3 }
  0x15   :  { %v55_v47 = vmul.f32 64.0, %v54_v39  ;;  %v197_v12 = vmul.f32 256.0, %v54_v39  ;;  %v108_v18 = vadd.s32 312, %v2101_v3  ;;  %v125_v19 = vadd.s32 448, %v2101_v3 }
  0x16   :  { %v2188_v20 = vcvt.s32.f32 %v109_v6  ;;  %v2190_v21 = vcvt.s32.f32 %v126_v7  ;;  %v77_v23 = vadd.s32 64, %v2101_v3  ;;  %v93_v26 = vadd.s32 192, %v2101_v3 }
  0x17   :  { %v56_v55 = vsub.f32 %v45_v14, %v55_v47  ;;  %v78_v14 = vadd.s32 72, %v2101_v3  ;;  %v107_v30 = vadd.s32 304, %v2101_v3  ;;  %v124_v31 = vadd.s32 440, %v2101_v3 }
  0x18   :  { %v2200_v36 = vcvt.s32.f32 %v94_v15  ;;  %v76_v38 = vadd.s32 56, %v2101_v3  ;;  %v92_v39 = vadd.s32 184, %v2101_v3  ;;  %v2205_v46 = vcvt.s32.f32 %v108_v18 }
  0x19   :  { %v64_v63 = vmul.f32 %v63_v51, %v56_v55  ;;  %v2198_v32 = vcvt.s32.f32 %v78_v14  ;;  %v2207_v47 = vcvt.s32.f32 %v125_v19  ;;  %v2209_v48 = vcvt.s32.f32 %v77_v23 }
  0x1a   :  { %v2211_v49 = vcvt.s32.f32 %v93_v26  ;;  %v106_v50 = vadd.s32 296, %v2101_v3  ;;  %v123_v51 = vadd.s32 432, %v2101_v3  ;;  %v2217_v54 = vcvt.s32.f32 %v107_v30 }
  0x1b   :  { %v2172_v8 = vfloor.f32 %v64_v63  ;;  %v75_v56 = vadd.s32 48, %v2101_v3  ;;  %v2222_v57 = vcvt.s32.f32 %v76_v38  ;;  %v2224_v58 = vcvt.s32.f32 %v92_v39 }
  0x1c   :  { %v91_v62 = vadd.s32 176, %v2101_v3  ;;  %v105_v63 = vadd.s32 288, %v2101_v3  ;;  %v2049_v6 = vmov 1.0   ;;  %v2242_v7 = vcvt.s32.f32 %v106_v50 }
  0x1d   :  { %3372 = vst [vmem:[#allocation5_spill] sm:$0xff] %v2172_v8  ;;  %v66_v16 = vmul.f32 8.0, %v2172_v8  ;;  %v198_v17 = vmul.f32 2.0, %v2172_v8  ;;  %v2254_v14 = vcvt.s32.f32 %v75_v56  ;;  %v122_v15 = vadd.s32 424, %v2101_v3 }
  0x1e   :  { %v2285_v18 = vcvt.s32.f32 %v91_v62  ;;  %v104_v19 = vadd.s32 280, %v2101_v3  ;;  %v2294_v23 = vcvt.s32.f32 %v105_v63  ;;  %v121_v26 = vadd.s32 416, %v2101_v3 }
  0x1f   :  { %v2194_v27 = vsub.f32 %v56_v55, %v66_v16  ;;  %v199_v28 = vmul.f32 16.0, %v198_v17  ;;  %v2219_v55 = vcvt.s32.f32 %v124_v31  ;;  %3375 = vst [vmem:[#allocation8_spill] sm:$0xff] %v2254_v14  ;;  %v74_v16 = vadd.s32 40, %v2101_v3 }
  0x20   :  { %v90_v17 = vadd.s32 168, %v2101_v3  ;;  %3376 = vst [vmem:[#allocation9_spill] sm:$0xff] %v2285_v18  ;;  %v73_v30 = vadd.s32 32, %v2101_v3  ;;  %v2340_v39 = vcvt.s32.f32 %v104_v19  ;;  %v103_v50 = vadd.s32 272, %v2101_v3 }
  0x21   :  { %3373 = vst [vmem:[#allocation6_spill] sm:$0xff] %v2194_v27  ;;  %v200_v42 = vadd.f32 %v199_v28, %v197_v12  ;;  %v201_v45 = vmul.f32 2.0, %v2194_v27  ;;  %v2244_v12 = vcvt.s32.f32 %v123_v51  ;;  %v2309_v28 = vcvt.s32.f32 %v122_v15 }
  0x22   :  { %3377 = vst [vmem:[#allocation10_spill] sm:$0xff] %v2294_v23  ;;  %v2324_v31 = vcvt.s32.f32 %v74_v16  ;;  %v2326_v38 = vcvt.s32.f32 %v90_v17  ;;  %v120_v51 = vadd.s32 408, %v2101_v3  ;;  %v72_v56 = vadd.s32 24, %v2101_v3 }
  0x23   :  { %v2215_v53 = vadd.f32 %v201_v45, %v200_v42  ;;  %3374 = vst [vmem:[#allocation7_spill] sm:$0xff] %v2244_v12  ;;  %v89_v42 = vadd.s32 160, %v2101_v3  ;;  %v2355_v45 = vcvt.s32.f32 %v121_v26  ;;  %v88_v62 = vadd.s32 152, %v2101_v3 }
  0x24   :  { %3378 = vst [vmem:[#allocation11_spill] sm:$0xff] %v2309_v28  ;;  %v102_v63 = vadd.s32 264, %v2101_v3  ;;  %v2398_v15 = vcvt.s32.f32 %v73_v30  ;;  %v2414_v17 = vcvt.s32.f32 %v103_v50  ;;  %v119_v19 = vadd.s32 400, %v2101_v3 }
  0x25   :  { %vm251_vm2 = vcmp.eq.f32.partialorder %v2110_v22, %v2215_v53  ;;  %vm250_vm3 = vcmp.eq.f32.partialorder %v2113_v24, %v2215_v53  ;;  %vm267_vm4 = vcmp.eq.f32.partialorder %v2115_v25, %v2215_v53  ;;  %vm219_vm5 = vcmp.eq.f32.partialorder %v2119_v29, %v2215_v53  ;;  %3379 = vst [vmem:[#allocation12_spill] sm:$0xff] %v2324_v31 }
  0x26   :  { %1578 = vmatpush.msk.msra.mxu2 %vm251_vm2, %v2049_v6  ;;  %1594 = vmatpush.msk.msra.mxu3 %vm267_vm4, %v2049_v6  ;;  %vm235_vm6 = vcmp.eq.f32.partialorder %v2123_v33, %v2215_v53  ;;  %vm266_vm7 = vcmp.eq.f32.partialorder %v2127_v35, %v2215_v53  ;;  %vm249_vm8 = vcmp.eq.f32.partialorder %v2125_v34, %v2215_v53  ;;  %v2400_v16 = vcvt.s32.f32 %v89_v42 }
  0x27   :  { %1546 = vmatpush.msk.msra.mxu0 %vm219_vm5, %v2049_v6  ;;  %1562 = vmatpush.msk.msra.mxu1 %vm235_vm6, %v2049_v6  ;;  %vm218_vm9 = vcmp.eq.f32.partialorder %v2129_v37, %v2215_v53  ;;  %vm234_vm10 = vcmp.eq.f32.partialorder %v2132_v40, %v2215_v53  ;;  %vm265_vm11 = vcmp.eq.f32.partialorder %v2137_v43, %v2215_v53  ;;  %v2429_v26 = vcvt.s32.f32 %v120_v51  ;;  %v28_v51 = vld [vmem:[%s3327_s0] sm:$0xff] }
  0x28   :  { %1579 = vmatpush.msk.msra.mxu2 %vm250_vm3, %v2049_v6  ;;  %1595 = vmatpush.msk.msra.mxu3 %vm266_vm7, %v2049_v6  ;;  %vm217_vm12 = vcmp.eq.f32.partialorder %v2139_v44, %v2215_v53  ;;  %vm233_vm13 = vcmp.eq.f32.partialorder %v2146_v52, %v2215_v53  ;;  %vm248_vm14 = vcmp.eq.f32.partialorder %v2134_v41, %v2215_v53  ;;  %v2431_v30 = vcvt.s32.f32 %v72_v56 }
  0x29   :  { %1547 = vmatpush.msk.msra.mxu0 %vm218_vm9, %v2049_v6  ;;  %1563 = vmatpush.msk.msra.mxu1 %vm234_vm10, %v2049_v6  ;;  %vm264_vm15 = vcmp.eq.f32.partialorder %v2155_v60, %v2215_v53  ;;  %vm216_vm0 = vcmp.eq.f32.partialorder %v2157_v61, %v2215_v53  ;;  %vm232_vm1 = vcmp.eq.f32.partialorder %v2160_v0, %v2215_v53  ;;  %v2445_v42 = vcvt.s32.f32 %v88_v62 }
  0x2a   :  { %1580 = vmatpush.msk.msra.mxu2 %vm249_vm8, %v2049_v6  ;;  %1596 = vmatpush.msk.msra.mxu3 %vm265_vm11, %v2049_v6  ;;  %vm247_vm2 = vcmp.eq.f32.partialorder %v2153_v59, %v2215_v53  ;;  %vm263_vm3 = vcmp.eq.f32.partialorder %v2164_v2, %v2215_v53  ;;  %vm215_vm4 = vcmp.eq.f32.partialorder %v2166_v4, %v2215_v53  ;;  %v2447_v50 = vcvt.s32.f32 %v102_v63 }
  0x2b   :  { %1548 = vmatpush.msk.msra.mxu0 %vm217_vm12, %v2049_v6  ;;  %1564 = vmatpush.msk.msra.mxu1 %vm233_vm13, %v2049_v6  ;;  %vm231_vm5 = vcmp.eq.f32.partialorder %v2168_v5, %v2215_v53  ;;  %vm246_vm6 = vcmp.eq.f32.partialorder %v2162_v1, %v2215_v53  ;;  %vm262_vm7 = vcmp.eq.f32.partialorder %v2176_v10, %v2215_v53  ;;  %v71_v56 = vadd.s32 16, %v2101_v3 }
  0x2c   :  { %1581 = vmatpush.msk.msra.mxu2 %vm248_vm14, %v2049_v6  ;;  %1597 = vmatpush.msk.msra.mxu3 %vm264_vm15, %v2049_v6  ;;  %3380 = vst [vmem:[#allocation13_spill] sm:$0xff] %v2326_v38  ;;  %vm214_vm8 = vcmp.eq.f32.partialorder %v2178_v11, %v2215_v53  ;;  %vm230_vm9 = vcmp.eq.f32.partialorder %v2180_v13, %v2215_v53  ;;  %v87_v62 = vadd.s32 144, %v2101_v3  ;;  %v2478_v63 = vcvt.s32.f32 %v119_v19 }
  0x2d   :  { %1549 = vmatpush.msk.msra.mxu0 %vm216_vm0, %v2049_v6  ;;  %1565 = vmatpush.msk.msra.mxu1 %vm232_vm1, %v2049_v6  ;;  %vm245_vm10 = vcmp.eq.f32.partialorder %v2174_v9, %v2215_v53  ;;  %vm261_vm11 = vcmp.eq.f32.partialorder %v2190_v21, %v2215_v53  ;;  %3381 = vst [vmem:[#allocation14_spill] sm:$0xff] %v2355_v45  ;;  %v118_v27 = vadd.s32 392, %v2101_v3  ;;  %v70_v19 = vadd.s32 8, %v2101_v3 }
  0x2e   :  { %1582 = vmatpush.msk.msra.mxu2 %vm247_vm2, %v2049_v6  ;;  %1598 = vmatpush.msk.msra.mxu3 %vm263_vm3, %v2049_v6  ;;  %vm213_vm12 = vcmp.eq.f32.partialorder %v2198_v32, %v2215_v53  ;;  %vm229_vm13 = vcmp.eq.f32.partialorder %v2200_v36, %v2215_v53  ;;  %vm244_vm14 = vcmp.eq.f32.partialorder %v2188_v20, %v2215_v53  ;;  %v86_v8 = vadd.s32 136, %v2101_v3 }
  0x2f   :  { %1550 = vmatpush.msk.msra.mxu0 %vm215_vm4, %v2049_v6  ;;  %1566 = vmatpush.msk.msra.mxu1 %vm231_vm5, %v2049_v6  ;;  %vm260_vm15 = vcmp.eq.f32.partialorder %v2207_v47, %v2215_v53  ;;  %vm212_vm0 = vcmp.eq.f32.partialorder %v2209_v48, %v2215_v53  ;;  %vm228_vm1 = vcmp.eq.f32.partialorder %v2211_v49, %v2215_v53 }
  0x30   :  { %1583 = vmatpush.msk.msra.mxu2 %vm246_vm6, %v2049_v6  ;;  %1599 = vmatpush.msk.msra.mxu3 %vm262_vm7, %v2049_v6  ;;  %3382 = vst [vmem:[#allocation15_spill] sm:$0xff] %v2398_v15  ;;  %vm243_vm2 = vcmp.eq.f32.partialorder %v2205_v46, %v2215_v53  ;;  %vm259_vm3 = vcmp.eq.f32.partialorder %v2219_v55, %v2215_v53 }
  0x31   :  { %1551 = vmatpush.msk.msra.mxu0 %vm214_vm8, %v2049_v6  ;;  %1567 = vmatpush.msk.msra.mxu1 %vm230_vm9, %v2049_v6  ;;  %3383 = vst [vmem:[#allocation16_spill] sm:$0xff] %v2400_v16  ;;  %vm211_vm4 = vcmp.eq.f32.partialorder %v2222_v57, %v2215_v53  ;;  %vm227_vm5 = vcmp.eq.f32.partialorder %v2224_v58, %v2215_v53 }
  0x32   :  { %1584 = vmatpush.msk.msra.mxu2 %vm245_vm10, %v2049_v6  ;;  %1600 = vmatpush.msk.msra.mxu3 %vm261_vm11, %v2049_v6  ;;  %3384 = vst [vmem:[#allocation17_spill] sm:$0xff] %v2414_v17  ;;  %vm242_vm6 = vcmp.eq.f32.partialorder %v2217_v54, %v2215_v53  ;;  %vm258_vm7 = vcmp.eq.f32.partialorder %v2244_v12, %v2215_v53  ;;  %v101_v12 = vadd.s32 256, %v2101_v3 }
  0x33   :  { %1552 = vmatpush.msk.msra.mxu0 %vm213_vm12, %v2049_v6  ;;  %1568 = vmatpush.msk.msra.mxu1 %vm229_vm13, %v2049_v6  ;;  %3385 = vst [vmem:[#allocation18_spill] sm:$0xff] %v2429_v26  ;;  %vm210_vm8 = vcmp.eq.f32.partialorder %v2254_v14, %v2215_v53  ;;  %vm226_vm9 = vcmp.eq.f32.partialorder %v2285_v18, %v2215_v53  ;;  %v2521_v18 = vcvt.s32.f32 %v71_v56  ;;  %v2523_v14 = vcvt.s32.f32 %v87_v62 }
  0x34   :  { %1585 = vmatpush.msk.msra.mxu2 %vm244_vm14, %v2049_v6  ;;  %1601 = vmatpush.msk.msra.mxu3 %vm260_vm15, %v2049_v6  ;;  %3386 = vst [vmem:[#allocation19_spill] sm:$0xff] %v2431_v30  ;;  %vm241_vm10 = vcmp.eq.f32.partialorder %v2242_v7, %v2215_v53  ;;  %vm257_vm11 = vcmp.eq.f32.partialorder %v2309_v28, %v2215_v53  ;;  %v2537_v56 = vcvt.s32.f32 %v118_v27  ;;  %v85_v62 = vadd.s32 128, %v2101_v3 }
  0x35   :  { %1553 = vmatpush.msk.msra.mxu0 %vm212_vm0, %v2049_v6  ;;  %1569 = vmatpush.msk.msra.mxu1 %vm228_vm1, %v2049_v6  ;;  %vm209_vm12 = vcmp.eq.f32.partialorder %v2324_v31, %v2215_v53  ;;  %vm225_vm13 = vcmp.eq.f32.partialorder %v2326_v38, %v2215_v53  ;;  %32 = vst [vmem:[#allocation1] ss:$2 sm:$0xff] %v28_v51  ;;  %v117_v51 = vadd.s32 384, %v2101_v3  ;;  %v2552_v27 = vcvt.s32.f32 %v70_v19 }
  0x36   :  { %1586 = vmatpush.msk.msra.mxu2 %vm243_vm2, %v2049_v6  ;;  %1602 = vmatpush.msk.msra.mxu3 %vm259_vm3, %v2049_v6  ;;  %vm240_vm14 = vcmp.eq.f32.partialorder %v2294_v23, %v2215_v53  ;;  %vm256_vm15 = vcmp.eq.f32.partialorder %v2355_v45, %v2215_v53  ;;  %vm208_vm0 = vcmp.eq.f32.partialorder %v2398_v15, %v2215_v53  ;;  %v2554_v38 = vcvt.s32.f32 %v86_v8  ;;  %v1481_v15 = vld [vmem:[%s3327_s0 + $0x8] sm:$0xff]  ;;  %s2050_s0 = smov 8  }
  0x37   :  { %1554 = vmatpush.msk.msra.mxu0 %vm211_vm4, %v2049_v6  ;;  %1570 = vmatpush.msk.msra.mxu1 %vm227_vm5, %v2049_v6  ;;  %vm224_vm1 = vcmp.eq.f32.partialorder %v2400_v16, %v2215_v53  ;;  %vm239_vm2 = vcmp.eq.f32.partialorder %v2340_v39, %v2215_v53  ;;  %vm255_vm3 = vcmp.eq.f32.partialorder %v2429_v26, %v2215_v53  ;;  %v2568_v19 = vcvt.s32.f32 %v101_v12 }
  0x38   :  { %1587 = vmatpush.msk.msra.mxu2 %vm242_vm6, %v2049_v6  ;;  %1603 = vmatpush.msk.msra.mxu3 %vm258_vm7, %v2049_v6  ;;  %vm207_vm4 = vcmp.eq.f32.partialorder %v2431_v30, %v2215_v53  ;;  %vm223_vm5 = vcmp.eq.f32.partialorder %v2445_v42, %v2215_v53  ;;  %vm238_vm6 = vcmp.eq.f32.partialorder %v2414_v17, %v2215_v53  ;;  %v2570_v8 = vcvt.s32.f32 %v117_v51 }
  0x39   :  { %1555 = vmatpush.msk.msra.mxu0 %vm210_vm8, %v2049_v6  ;;  %1571 = vmatpush.msk.msra.mxu1 %vm226_vm9, %v2049_v6  ;;  %vm254_vm7 = vcmp.eq.f32.partialorder %v2478_v63, %v2215_v53  ;;  %vm206_vm8 = vcmp.eq.f32.partialorder %v2521_v18, %v2215_v53  ;;  %vm222_vm9 = vcmp.eq.f32.partialorder %v2523_v14, %v2215_v53  ;;  %v2588_v12 = vadd.f32 1.0, %v2215_v53 }
  0x3a   :  { %1588 = vmatpush.msk.msra.mxu2 %vm241_vm10, %v2049_v6  ;;  %1604 = vmatpush.msk.msra.mxu3 %vm257_vm11, %v2049_v6  ;;  %vm237_vm10 = vcmp.eq.f32.partialorder %v2447_v50, %v2215_v53  ;;  %vm253_vm11 = vcmp.eq.f32.partialorder %v2537_v56, %v2215_v53  ;;  %v2603_v51 = vcvt.s32.f32 %v2101_v3  ;;  %v2605_v26 = vcvt.s32.f32 %v85_v62  ;;  %v3389_v3 = vld [vmem:[#allocation7_spill] sm:$0xff]  ;;  %v3391_v62 = vld [vmem:[#allocation9_spill] sm:$0xff] }
  0x3b   :  { %1556 = vmatpush.msk.msra.mxu0 %vm209_vm12, %v2049_v6  ;;  %1572 = vmatpush.msk.msra.mxu1 %vm225_vm13, %v2049_v6  ;;  %vm205_vm12 = vcmp.eq.f32.partialorder %v2552_v27, %v2215_v53  ;;  %vm221_vm13 = vcmp.eq.f32.partialorder %v2554_v38, %v2215_v53 }
  0x3c   :  { %1589 = vmatpush.msk.msra.mxu2 %vm240_vm14, %v2049_v6  ;;  %1605 = vmatpush.msk.msra.mxu3 %vm256_vm15, %v2049_v6  ;;  %v2607_v16 = vld.sshfl [vmem:[#allocation1] sm:$0xff pattern:$0x75316420]  ;;  %v2609_v30 = vld.sshfl [vmem:[#allocation1 + $0x8] sm:$0xff pattern:$0x75316420]  ;;  %vm236_vm14 = vcmp.eq.f32.partialorder %v2568_v19, %v2215_v53  ;;  %vm252_vm15 = vcmp.eq.f32.partialorder %v2570_v8, %v2215_v53 }
  0x3d   :  { %1557 = vmatpush.msk.msra.mxu0 %vm208_vm0, %v2049_v6  ;;  %1573 = vmatpush.msk.msra.mxu1 %vm224_vm1, %v2049_v6  ;;  %3387 = vst [vmem:[#allocation20_spill] sm:$0xff] %v2607_v16  ;;  %vm524_vm0 = vcmp.eq.f32.partialorder %v2110_v22, %v2588_v12  ;;  %vm540_vm1 = vcmp.eq.f32.partialorder %v2115_v25, %v2588_v12 }
  0x3e   :  { %1590 = vmatpush.msk.msra.mxu2 %vm239_vm2, %v2049_v6  ;;  %1606 = vmatpush.msk.msra.mxu3 %vm255_vm3, %v2049_v6  ;;  %3388 = vst [vmem:[#allocation21_spill] sm:$0xff] %v2609_v30  ;;  %vm204_vm2 = vcmp.eq.f32.partialorder %v2603_v51, %v2215_v53  ;;  %vm220_vm3 = vcmp.eq.f32.partialorder %v2605_v26, %v2215_v53 }
  0x3f   :  { %1558 = vmatpush.msk.msra.mxu0 %vm207_vm4, %v2049_v6  ;;  %1574 = vmatpush.msk.msra.mxu1 %vm223_vm5, %v2049_v6  ;;  %38 = vst [vmem:[#allocation1] ss:$2 sm:$0xff] %v1481_v15  ;;  %vm523_vm4 = vcmp.eq.f32.partialorder %v2113_v24, %v2588_v12  ;;  %vm492_vm5 = vcmp.eq.f32.partialorder %v2119_v29, %v2588_v12  ;;  %v3390_v15 = vld [vmem:[#allocation8_spill] sm:$0xff] }
  0x40   :  { %1591 = vmatpush.msk.msra.mxu2 %vm238_vm6, %v2049_v6  ;;  %1607 = vmatpush.msk.msra.mxu3 %vm254_vm7, %v2049_v6  ;;  %vm508_vm6 = vcmp.eq.f32.partialorder %v2123_v33, %v2588_v12  ;;  %vm539_vm7 = vcmp.eq.f32.partialorder %v2127_v35, %v2588_v12 }
  0x41   :  { %1559 = vmatpush.msk.msra.mxu0 %vm206_vm8, %v2049_v6  ;;  %1575 = vmatpush.msk.msra.mxu1 %vm222_vm9, %v2049_v6  ;;  %vm522_vm8 = vcmp.eq.f32.partialorder %v2125_v34, %v2588_v12  ;;  %vm491_vm9 = vcmp.eq.f32.partialorder %v2129_v37, %v2588_v12 }
  0x42   :  { %1592 = vmatpush.msk.msra.mxu2 %vm237_vm10, %v2049_v6  ;;  %1608 = vmatpush.msk.msra.mxu3 %vm253_vm11, %v2049_v6  ;;  %vm507_vm10 = vcmp.eq.f32.partialorder %v2132_v40, %v2588_v12  ;;  %vm538_vm11 = vcmp.eq.f32.partialorder %v2137_v43, %v2588_v12 }
  0x43   :  { %1560 = vmatpush.msk.msra.mxu0 %vm205_vm12, %v2049_v6  ;;  %1576 = vmatpush.msk.msra.mxu1 %vm221_vm13, %v2049_v6  ;;  %vm521_vm12 = vcmp.eq.f32.partialorder %v2134_v41, %v2588_v12  ;;  %vm490_vm13 = vcmp.eq.f32.partialorder %v2139_v44, %v2588_v12 }
  0x44   :  { %1593 = vmatpush.msk.msra.mxu2 %vm236_vm14, %v2049_v6  ;;  %1609 = vmatpush.msk.msra.mxu3 %vm252_vm15, %v2049_v6  ;;  %vm506_vm14 = vcmp.eq.f32.partialorder %v2146_v52, %v2588_v12  ;;  %vm537_vm15 = vcmp.eq.f32.partialorder %v2155_v60, %v2588_v12 }
  0x45   :  { %1561 = vmatpush.msk.msra.mxu0 %vm204_vm2, %v2049_v6  ;;  %1577 = vmatpush.msk.msra.mxu1 %vm220_vm3, %v2049_v6  ;;  %vm505_vm2 = vcmp.eq.f32.partialorder %v2160_v0, %v2588_v12  ;;  %vm536_vm3 = vcmp.eq.f32.partialorder %v2164_v2, %v2588_v12 }
  0x46   :  { %1706 = vmatpush.msk.msrb.mxu2 %vm524_vm0, %v2049_v6  ;;  %1722 = vmatpush.msk.msrb.mxu3 %vm540_vm1, %v2049_v6  ;;  %vm520_vm0 = vcmp.eq.f32.partialorder %v2153_v59, %v2588_v12  ;;  %vm489_vm1 = vcmp.eq.f32.partialorder %v2157_v61, %v2588_v12 }
  0x47   :  { %1674 = vmatpush.msk.msrb.mxu0 %vm492_vm5, %v2049_v6  ;;  %1690 = vmatpush.msk.msrb.mxu1 %vm508_vm6, %v2049_v6  ;;  %vm488_vm5 = vcmp.eq.f32.partialorder %v2166_v4, %v2588_v12  ;;  %vm504_vm6 = vcmp.eq.f32.partialorder %v2168_v5, %v2588_v12 }
  0x48   :  { %1707 = vmatpush.msk.msrb.mxu2 %vm523_vm4, %v2049_v6  ;;  %1723 = vmatpush.msk.msrb.mxu3 %vm539_vm7, %v2049_v6  ;;  %vm519_vm4 = vcmp.eq.f32.partialorder %v2162_v1, %v2588_v12  ;;  %vm535_vm7 = vcmp.eq.f32.partialorder %v2176_v10, %v2588_v12 }
  0x49   :  { %1675 = vmatpush.msk.msrb.mxu0 %vm491_vm9, %v2049_v6  ;;  %1691 = vmatpush.msk.msrb.mxu1 %vm507_vm10, %v2049_v6  ;;  %vm487_vm9 = vcmp.eq.f32.partialorder %v2178_v11, %v2588_v12  ;;  %vm503_vm10 = vcmp.eq.f32.partialorder %v2180_v13, %v2588_v12 }
  0x4a   :  { %1708 = vmatpush.msk.msrb.mxu2 %vm522_vm8, %v2049_v6  ;;  %1724 = vmatpush.msk.msrb.mxu3 %vm538_vm11, %v2049_v6  ;;  %vm518_vm8 = vcmp.eq.f32.partialorder %v2174_v9, %v2588_v12  ;;  %vm534_vm11 = vcmp.eq.f32.partialorder %v2190_v21, %v2588_v12 }
  0x4b   :  { %1676 = vmatpush.msk.msrb.mxu0 %vm490_vm13, %v2049_v6  ;;  %1692 = vmatpush.msk.msrb.mxu1 %vm506_vm14, %v2049_v6  ;;  %vm486_vm13 = vcmp.eq.f32.partialorder %v2198_v32, %v2588_v12  ;;  %vm502_vm14 = vcmp.eq.f32.partialorder %v2200_v36, %v2588_v12 }
  0x4c   :  { %1709 = vmatpush.msk.msrb.mxu2 %vm521_vm12, %v2049_v6  ;;  %1725 = vmatpush.msk.msrb.mxu3 %vm537_vm15, %v2049_v6  ;;  %vm517_vm12 = vcmp.eq.f32.partialorder %v2188_v20, %v2588_v12  ;;  %vm533_vm15 = vcmp.eq.f32.partialorder %v2207_v47, %v2588_v12 }
  0x4d   :  { %1677 = vmatpush.msk.msrb.mxu0 %vm489_vm1, %v2049_v6  ;;  %1693 = vmatpush.msk.msrb.mxu1 %vm505_vm2, %v2049_v6  ;;  %vm485_vm1 = vcmp.eq.f32.partialorder %v2209_v48, %v2588_v12  ;;  %vm501_vm2 = vcmp.eq.f32.partialorder %v2211_v49, %v2588_v12 }
  0x4e   :  { %1710 = vmatpush.msk.msrb.mxu2 %vm520_vm0, %v2049_v6  ;;  %1726 = vmatpush.msk.msrb.mxu3 %vm536_vm3, %v2049_v6  ;;  %vm516_vm0 = vcmp.eq.f32.partialorder %v2205_v46, %v2588_v12  ;;  %vm532_vm3 = vcmp.eq.f32.partialorder %v2219_v55, %v2588_v12 }
  0x4f   :  { %1678 = vmatpush.msk.msrb.mxu0 %vm488_vm5, %v2049_v6  ;;  %1694 = vmatpush.msk.msrb.mxu1 %vm504_vm6, %v2049_v6  ;;  %vm484_vm5 = vcmp.eq.f32.partialorder %v2222_v57, %v2588_v12  ;;  %vm500_vm6 = vcmp.eq.f32.partialorder %v2224_v58, %v2588_v12 }
  0x50   :  { %1711 = vmatpush.msk.msrb.mxu2 %vm519_vm4, %v2049_v6  ;;  %1727 = vmatpush.msk.msrb.mxu3 %vm535_vm7, %v2049_v6  ;;  %vm515_vm4 = vcmp.eq.f32.partialorder %v2217_v54, %v2588_v12  ;;  %vm531_vm7 = vcmp.eq.f32.partialorder %v3389_v3, %v2588_v12 }
  0x51   :  { %1679 = vmatpush.msk.msrb.mxu0 %vm487_vm9, %v2049_v6  ;;  %1695 = vmatpush.msk.msrb.mxu1 %vm503_vm10, %v2049_v6  ;;  %vm483_vm9 = vcmp.eq.f32.partialorder %v3390_v15, %v2588_v12  ;;  %vm499_vm10 = vcmp.eq.f32.partialorder %v3391_v62, %v2588_v12  ;;  %v2775_v15 = vld.sshfl [vmem:[#allocation1] sm:$0xff pattern:$0x75316420]  ;;  %v3393_v62 = vld [vmem:[#allocation13_spill] sm:$0xff] }
  0x52   :  { %1712 = vmatpush.msk.msrb.mxu2 %vm518_vm8, %v2049_v6  ;;  %1728 = vmatpush.msk.msrb.mxu3 %vm534_vm11, %v2049_v6  ;;  %vm514_vm8 = vcmp.eq.f32.partialorder %v2242_v7, %v2588_v12  ;;  %vm530_vm11 = vcmp.eq.f32.partialorder %v2309_v28, %v2588_v12  ;;  %3392 = vst [vmem:[#allocation7_spill] sm:$0xff] %v2775_v15  ;;  %v3395_v28 = vld [vmem:[#allocation15_spill] sm:$0xff] }
  0x53   :  { %1680 = vmatpush.msk.msrb.mxu0 %vm486_vm13, %v2049_v6  ;;  %1696 = vmatpush.msk.msrb.mxu1 %vm502_vm14, %v2049_v6  ;;  %vm482_vm13 = vcmp.eq.f32.partialorder %v2324_v31, %v2588_v12  ;;  %vm498_vm14 = vcmp.eq.f32.partialorder %v3393_v62, %v2588_v12  ;;  %v2787_v31 = vld.sshfl [vmem:[#allocation1 + $0x8] sm:$0xff pattern:$0x75316420] }
  0x54   :  { %1713 = vmatpush.msk.msrb.mxu2 %vm517_vm12, %v2049_v6  ;;  %1729 = vmatpush.msk.msrb.mxu3 %vm533_vm15, %v2049_v6  ;;  %vm513_vm12 = vcmp.eq.f32.partialorder %v2294_v23, %v2588_v12  ;;  %vm512_vm15 = vcmp.eq.f32.partialorder %v2340_v39, %v2588_v12  ;;  %3394 = vst [vmem:[#allocation22_spill] sm:$0xff] %v2787_v31  ;;  %v3396_v62 = vld [vmem:[#allocation16_spill] sm:$0xff] }
  0x55   :  { %1681 = vmatpush.msk.msrb.mxu0 %vm485_vm1, %v2049_v6  ;;  %1697 = vmatpush.msk.msrb.mxu1 %vm501_vm2, %v2049_v6  ;;  %vm481_vm1 = vcmp.eq.f32.partialorder %v3395_v28, %v2588_v12  ;;  %vm497_vm2 = vcmp.eq.f32.partialorder %v3396_v62, %v2588_v12  ;;  %v3398_v28 = vld [vmem:[#allocation19_spill] sm:$0xff] }
  0x56   :  { %1714 = vmatpush.msk.msrb.mxu2 %vm516_vm0, %v2049_v6  ;;  %1730 = vmatpush.msk.msrb.mxu3 %vm532_vm3, %v2049_v6  ;;  %vm529_vm0 = vcmp.eq.f32.partialorder %v2355_v45, %v2588_v12  ;;  %vm511_vm3 = vcmp.eq.f32.partialorder %v2414_v17, %v2588_v12  ;;  %v3397_v45 = vld [vmem:[#allocation18_spill] sm:$0xff]  ;;  %v2812_v17 = vadd.f32 16.0, %v2215_v53 }
  0x57   :  { %1682 = vmatpush.msk.msrb.mxu0 %vm484_vm5, %v2049_v6  ;;  %1698 = vmatpush.msk.msrb.mxu1 %vm500_vm6, %v2049_v6  ;;  %vm480_vm5 = vcmp.eq.f32.partialorder %v3398_v28, %v2588_v12  ;;  %vm496_vm6 = vcmp.eq.f32.partialorder %v2445_v42, %v2588_v12 }
  0x58   :  { %1715 = vmatpush.msk.msrb.mxu2 %vm515_vm4, %v2049_v6  ;;  %1731 = vmatpush.msk.msrb.mxu3 %vm531_vm7, %v2049_v6  ;;  %vm528_vm4 = vcmp.eq.f32.partialorder %v3397_v45, %v2588_v12  ;;  %vm510_vm7 = vcmp.eq.f32.partialorder %v2447_v50, %v2588_v12 }
  0x59   :  { %1683 = vmatpush.msk.msrb.mxu0 %vm483_vm9, %v2049_v6  ;;  %1699 = vmatpush.msk.msrb.mxu1 %vm499_vm10, %v2049_v6  ;;  %vm479_vm9 = vcmp.eq.f32.partialorder %v2521_v18, %v2588_v12  ;;  %vm495_vm10 = vcmp.eq.f32.partialorder %v2523_v14, %v2588_v12 }
  0x5a   :  { %1716 = vmatpush.msk.msrb.mxu2 %vm514_vm8, %v2049_v6  ;;  %1732 = vmatpush.msk.msrb.mxu3 %vm530_vm11, %v2049_v6  ;;  %vm527_vm8 = vcmp.eq.f32.partialorder %v2478_v63, %v2588_v12  ;;  %vm509_vm11 = vcmp.eq.f32.partialorder %v2568_v19, %v2588_v12 }
  0x5b   :  { %1684 = vmatpush.msk.msrb.mxu0 %vm482_vm13, %v2049_v6  ;;  %452 = vmatmul.f32.vlgmr.msra.gmra.mxu2 %v2775_v15  ;;  %vm798_vm13 = vcmp.eq.f32.partialorder %v2110_v22, %v2812_v17 }
  0x5c   :  { %1717 = vmatpush.msk.msrb.mxu2 %vm513_vm12, %v2049_v6  ;;  %1700 = vmatpush.msk.msrb.mxu1 %vm498_vm14, %v2049_v6  ;;  %vm526_vm12 = vcmp.eq.f32.partialorder %v2537_v56, %v2588_v12  ;;  %vm478_vm14 = vcmp.eq.f32.partialorder %v2552_v27, %v2588_v12 }
  0x5d   :  { %1733 = vmatpush.msk.msrb.mxu3 %vm529_vm0, %v2049_v6  ;;  %1685 = vmatpush.msk.msrb.mxu0 %vm481_vm1, %v2049_v6  ;;  %vm525_vm0 = vcmp.eq.f32.partialorder %v2570_v8, %v2588_v12  ;;  %vm797_vm1 = vcmp.eq.f32.partialorder %v2113_v24, %v2812_v17 }
  0x5e   :  { %1718 = vmatpush.msk.msrb.mxu2 %vm512_vm15, %v2049_v6  ;;  %472 = vmatmul.f32.vlgmr.msra.gmra.mxu3 %v2787_v31  ;;  %vm494_vm15 = vcmp.eq.f32.partialorder %v2554_v38, %v2588_v12 }
  0x5f   :  { %1701 = vmatpush.msk.msrb.mxu1 %vm497_vm2, %v2049_v6  ;;  %1734 = vmatpush.msk.msrb.mxu3 %vm528_vm4, %v2049_v6  ;;  %vm814_vm2 = vcmp.eq.f32.partialorder %v2115_v25, %v2812_v17  ;;  %vm493_vm4 = vcmp.eq.f32.partialorder %v2605_v26, %v2588_v12 }
  0x60   :  { %1719 = vmatpush.msk.msrb.mxu2 %vm511_vm3, %v2049_v6  ;;  %412 = vmatmul.f32.vlgmr.msra.gmra.mxu0 %v2607_v16  ;;  %vm477_vm3 = vcmp.eq.f32.partialorder %v2603_v51, %v2588_v12  ;;  %v3399_v12 = vld [vmem:[#allocation8_spill] sm:$0xff] }
  0x61   :  { %432 = vmatmul.f32.vlgmr.msra.gmra.mxu1 %v2609_v30  ;;  %1686 = vmatpush.msk.msrb.mxu0 %vm480_vm5, %v2049_v6  ;;  %vm766_vm5 = vcmp.eq.f32.partialorder %v2119_v29, %v2812_v17 }
  0x62   :  { %1702 = vmatpush.msk.msrb.mxu1 %vm496_vm6, %v2049_v6  ;;  %1720 = vmatpush.msk.msrb.mxu2 %vm510_vm7, %v2049_v6  ;;  %vm782_vm6 = vcmp.eq.f32.partialorder %v2123_v33, %v2812_v17  ;;  %vm796_vm7 = vcmp.eq.f32.partialorder %v2125_v34, %v2812_v17 }
  0x63   :  { %1735 = vmatpush.msk.msrb.mxu3 %vm527_vm8, %v2049_v6  ;;  %1687 = vmatpush.msk.msrb.mxu0 %vm479_vm9, %v2049_v6  ;;  %vm813_vm8 = vcmp.eq.f32.partialorder %v2127_v35, %v2812_v17  ;;  %vm765_vm9 = vcmp.eq.f32.partialorder %v2129_v37, %v2812_v17 }
  0x64   :  { %1703 = vmatpush.msk.msrb.mxu1 %vm495_vm10, %v2049_v6  ;;  %1721 = vmatpush.msk.msrb.mxu2 %vm509_vm11, %v2049_v6  ;;  %vm781_vm10 = vcmp.eq.f32.partialorder %v2132_v40, %v2812_v17  ;;  %vm795_vm11 = vcmp.eq.f32.partialorder %v2134_v41, %v2812_v17 }
  0x65   :  { %1736 = vmatpush.msk.msrb.mxu3 %vm526_vm12, %v2049_v6  ;;  %725 = vmatmul.f32.vlgmr.msrb.gmra.mxu2 %v2775_v15  ;;  %vm812_vm12 = vcmp.eq.f32.partialorder %v2137_v43, %v2812_v17  ;;  %v3403_v15 = vld [vmem:[#allocation13_spill] sm:$0xff] }
  0x66   :  { %1834 = vmatpush.msk.msra.mxu2 %vm798_vm13, %v2049_v6  ;;  %1688 = vmatpush.msk.msrb.mxu0 %vm478_vm14, %v2049_v6  ;;  %vm764_vm13 = vcmp.eq.f32.partialorder %v2139_v44, %v2812_v17  ;;  %vm780_vm14 = vcmp.eq.f32.partialorder %v2146_v52, %v2812_v17 }
  0x67   :  { %1704 = vmatpush.msk.msrb.mxu1 %vm494_vm15, %v2049_v6  ;;  %1737 = vmatpush.msk.msrb.mxu3 %vm525_vm0, %v2049_v6  ;;  %vm794_vm15 = vcmp.eq.f32.partialorder %v2153_v59, %v2812_v17  ;;  %vm811_vm0 = vcmp.eq.f32.partialorder %v2155_v60, %v2812_v17 }
  0x68   :  { %745 = vmatmul.f32.vlgmr.msrb.gmra.mxu3 %v2787_v31  ;;  %1835 = vmatpush.msk.msra.mxu2 %vm797_vm1, %v2049_v6  ;;  %vm763_vm1 = vcmp.eq.f32.partialorder %v2157_v61, %v2812_v17  ;;  %v3402_v31 = vld [vmem:[#allocation12_spill] sm:$0xff] }
  0x69   :  { %1850 = vmatpush.msk.msra.mxu3 %vm814_vm2, %v2049_v6  ;;  %1689 = vmatpush.msk.msrb.mxu0 %vm477_vm3, %v2049_v6  ;;  %vm779_vm2 = vcmp.eq.f32.partialorder %v2160_v0, %v2812_v17  ;;  %vm793_vm3 = vcmp.eq.f32.partialorder %v2162_v1, %v2812_v17 }
  0x6a   :  { %1705 = vmatpush.msk.msrb.mxu1 %vm493_vm4, %v2049_v6  ;;  %685 = vmatmul.f32.vlgmr.msrb.gmra.mxu0 %v2607_v16  ;;  %vm810_vm4 = vcmp.eq.f32.partialorder %v2164_v2, %v2812_v17  ;;  %v3401_v16 = vld [vmem:[#allocation11_spill] sm:$0xff] }
  0x6b   :  { %705 = vmatmul.f32.vlgmr.msrb.gmra.mxu1 %v2609_v30  ;;  %1802 = vmatpush.msk.msra.mxu0 %vm766_vm5, %v2049_v6  ;;  %vm762_vm5 = vcmp.eq.f32.partialorder %v2166_v4, %v2812_v17  ;;  %v3400_v30 = vld [vmem:[#allocation9_spill] sm:$0xff] }
  0x6c   :  { %1818 = vmatpush.msk.msra.mxu1 %vm782_vm6, %v2049_v6  ;;  %1836 = vmatpush.msk.msra.mxu2 %vm796_vm7, %v2049_v6  ;;  %vm778_vm6 = vcmp.eq.f32.partialorder %v2168_v5, %v2812_v17  ;;  %vm792_vm7 = vcmp.eq.f32.partialorder %v2174_v9, %v2812_v17 }
  0x6d   :  { %1851 = vmatpush.msk.msra.mxu3 %vm813_vm8, %v2049_v6  ;;  %1803 = vmatpush.msk.msra.mxu0 %vm765_vm9, %v2049_v6  ;;  %vm809_vm8 = vcmp.eq.f32.partialorder %v2176_v10, %v2812_v17  ;;  %vm761_vm9 = vcmp.eq.f32.partialorder %v2178_v11, %v2812_v17 }
  0x6e   :  { %1819 = vmatpush.msk.msra.mxu1 %vm781_vm10, %v2049_v6  ;;  %1837 = vmatpush.msk.msra.mxu2 %vm795_vm11, %v2049_v6  ;;  %vm777_vm10 = vcmp.eq.f32.partialorder %v2180_v13, %v2812_v17  ;;  %vm791_vm11 = vcmp.eq.f32.partialorder %v2188_v20, %v2812_v17 }
  0x6f   :  { %1852 = vmatpush.msk.msra.mxu3 %vm812_vm12, %v2049_v6  ;;  %1804 = vmatpush.msk.msra.mxu0 %vm764_vm13, %v2049_v6  ;;  %vm808_vm12 = vcmp.eq.f32.partialorder %v2190_v21, %v2812_v17  ;;  %vm760_vm13 = vcmp.eq.f32.partialorder %v2198_v32, %v2812_v17 }
  0x70   :  { %1820 = vmatpush.msk.msra.mxu1 %vm780_vm14, %v2049_v6  ;;  %1838 = vmatpush.msk.msra.mxu2 %vm794_vm15, %v2049_v6  ;;  %vm776_vm14 = vcmp.eq.f32.partialorder %v2200_v36, %v2812_v17  ;;  %vm790_vm15 = vcmp.eq.f32.partialorder %v2205_v46, %v2812_v17 }
  0x71   :  { %1853 = vmatpush.msk.msra.mxu3 %vm811_vm0, %v2049_v6  ;;  %1805 = vmatpush.msk.msra.mxu0 %vm763_vm1, %v2049_v6  ;;  %vm807_vm0 = vcmp.eq.f32.partialorder %v2207_v47, %v2812_v17  ;;  %vm759_vm1 = vcmp.eq.f32.partialorder %v2209_v48, %v2812_v17 }
  0x72   :  { %1821 = vmatpush.msk.msra.mxu1 %vm779_vm2, %v2049_v6  ;;  %1839 = vmatpush.msk.msra.mxu2 %vm793_vm3, %v2049_v6  ;;  %vm775_vm2 = vcmp.eq.f32.partialorder %v2211_v49, %v2812_v17  ;;  %vm789_vm3 = vcmp.eq.f32.partialorder %v2217_v54, %v2812_v17 }
  0x73   :  { %1854 = vmatpush.msk.msra.mxu3 %vm810_vm4, %v2049_v6  ;;  %1806 = vmatpush.msk.msra.mxu0 %vm762_vm5, %v2049_v6  ;;  %vm806_vm4 = vcmp.eq.f32.partialorder %v2219_v55, %v2812_v17  ;;  %vm758_vm5 = vcmp.eq.f32.partialorder %v2222_v57, %v2812_v17 }
  0x74   :  { %1822 = vmatpush.msk.msra.mxu1 %vm778_vm6, %v2049_v6  ;;  %1840 = vmatpush.msk.msra.mxu2 %vm792_vm7, %v2049_v6  ;;  %vm774_vm6 = vcmp.eq.f32.partialorder %v2224_v58, %v2812_v17  ;;  %vm788_vm7 = vcmp.eq.f32.partialorder %v2242_v7, %v2812_v17 }
  0x75   :  { %1855 = vmatpush.msk.msra.mxu3 %vm809_vm8, %v2049_v6  ;;  %1807 = vmatpush.msk.msra.mxu0 %vm761_vm9, %v2049_v6  ;;  %vm805_vm8 = vcmp.eq.f32.partialorder %v3389_v3, %v2812_v17  ;;  %vm757_vm9 = vcmp.eq.f32.partialorder %v3399_v12, %v2812_v17 }
  0x76   :  { %1823 = vmatpush.msk.msra.mxu1 %vm777_vm10, %v2049_v6  ;;  %1841 = vmatpush.msk.msra.mxu2 %vm791_vm11, %v2049_v6  ;;  %vm773_vm10 = vcmp.eq.f32.partialorder %v3400_v30, %v2812_v17  ;;  %vm787_vm11 = vcmp.eq.f32.partialorder %v2294_v23, %v2812_v17  ;;  %v3404_v23 = vld [vmem:[#allocation14_spill] sm:$0xff] }
  0x77   :  { %1856 = vmatpush.msk.msra.mxu3 %vm808_vm12, %v2049_v6  ;;  %1808 = vmatpush.msk.msra.mxu0 %vm760_vm13, %v2049_v6  ;;  %vm804_vm12 = vcmp.eq.f32.partialorder %v3401_v16, %v2812_v17  ;;  %vm756_vm13 = vcmp.eq.f32.partialorder %v3402_v31, %v2812_v17  ;;  %v3405_v16 = vld [vmem:[#allocation15_spill] sm:$0xff] }
  0x78   :  { %1824 = vmatpush.msk.msra.mxu1 %vm776_vm14, %v2049_v6  ;;  %1842 = vmatpush.msk.msra.mxu2 %vm790_vm15, %v2049_v6  ;;  %vm772_vm14 = vcmp.eq.f32.partialorder %v3403_v15, %v2812_v17  ;;  %vm786_vm15 = vcmp.eq.f32.partialorder %v2340_v39, %v2812_v17  ;;  %v3406_v15 = vld [vmem:[#allocation17_spill] sm:$0xff] }
  0x79   :  { %1857 = vmatpush.msk.msra.mxu3 %vm807_vm0, %v2049_v6  ;;  %1809 = vmatpush.msk.msra.mxu0 %vm759_vm1, %v2049_v6  ;;  %vm803_vm0 = vcmp.eq.f32.partialorder %v3404_v23, %v2812_v17  ;;  %vm755_vm1 = vcmp.eq.f32.partialorder %v3405_v16, %v2812_v17  ;;  %v3005_v16 = vadd.f32 17.0, %v2215_v53 }
  0x7a   :  { %1825 = vmatpush.msk.msra.mxu1 %vm775_vm2, %v2049_v6  ;;  %1843 = vmatpush.msk.msra.mxu2 %vm789_vm3, %v2049_v6  ;;  %vm771_vm2 = vcmp.eq.f32.partialorder %v3396_v62, %v2812_v17  ;;  %vm785_vm3 = vcmp.eq.f32.partialorder %v3406_v15, %v2812_v17 }
  0x7b   :  { %1858 = vmatpush.msk.msra.mxu3 %vm806_vm4, %v2049_v6  ;;  %1810 = vmatpush.msk.msra.mxu0 %vm758_vm5, %v2049_v6  ;;  %vm802_vm4 = vcmp.eq.f32.partialorder %v3397_v45, %v2812_v17  ;;  %vm754_vm5 = vcmp.eq.f32.partialorder %v3398_v28, %v2812_v17 }
  0x7c   :  { %1826 = vmatpush.msk.msra.mxu1 %vm774_vm6, %v2049_v6  ;;  %1844 = vmatpush.msk.msra.mxu2 %vm788_vm7, %v2049_v6  ;;  %vm770_vm6 = vcmp.eq.f32.partialorder %v2445_v42, %v2812_v17  ;;  %vm784_vm7 = vcmp.eq.f32.partialorder %v2447_v50, %v2812_v17 }
  0x7d   :  { %1859 = vmatpush.msk.msra.mxu3 %vm805_vm8, %v2049_v6  ;;  %1811 = vmatpush.msk.msra.mxu0 %vm757_vm9, %v2049_v6  ;;  %vm801_vm8 = vcmp.eq.f32.partialorder %v2478_v63, %v2812_v17  ;;  %vm753_vm9 = vcmp.eq.f32.partialorder %v2521_v18, %v2812_v17 }
  0x7e   :  { %1827 = vmatpush.msk.msra.mxu1 %vm773_vm10, %v2049_v6  ;;  %1845 = vmatpush.msk.msra.mxu2 %vm787_vm11, %v2049_v6  ;;  %vm769_vm10 = vcmp.eq.f32.partialorder %v2523_v14, %v2812_v17  ;;  %vm783_vm11 = vcmp.eq.f32.partialorder %v2568_v19, %v2812_v17 }
  0x7f   :  { %1860 = vmatpush.msk.msra.mxu3 %vm804_vm12, %v2049_v6  ;;  %1812 = vmatpush.msk.msra.mxu0 %vm756_vm13, %v2049_v6  ;;  %vm800_vm12 = vcmp.eq.f32.partialorder %v2537_v56, %v2812_v17  ;;  %vm1071_vm13 = vcmp.eq.f32.partialorder %v2110_v22, %v3005_v16  ;;  %v3407_v22 = vld [vmem:[#allocation10_spill] sm:$0xff] }
  0x80   :  { %1828 = vmatpush.msk.msra.mxu1 %vm772_vm14, %v2049_v6  ;;  %1846 = vmatpush.msk.msra.mxu2 %vm786_vm15, %v2049_v6  ;;  %vm752_vm14 = vcmp.eq.f32.partialorder %v2552_v27, %v2812_v17  ;;  %vm768_vm15 = vcmp.eq.f32.partialorder %v2554_v38, %v2812_v17 }
  0x81   :  { %1861 = vmatpush.msk.msra.mxu3 %vm803_vm0, %v2049_v6  ;;  %1813 = vmatpush.msk.msra.mxu0 %vm755_vm1, %v2049_v6  ;;  %vm799_vm0 = vcmp.eq.f32.partialorder %v2570_v8, %v2812_v17  ;;  %vm1070_vm1 = vcmp.eq.f32.partialorder %v2113_v24, %v3005_v16  ;;  %v3408_v24 = vld [vmem:[#allocation11_spill] sm:$0xff] }
  0x82   :  { %1829 = vmatpush.msk.msra.mxu1 %vm771_vm2, %v2049_v6  ;;  %1847 = vmatpush.msk.msra.mxu2 %vm785_vm3, %v2049_v6  ;;  %vm1087_vm2 = vcmp.eq.f32.partialorder %v2115_v25, %v3005_v16  ;;  %vm751_vm3 = vcmp.eq.f32.partialorder %v2603_v51, %v2812_v17  ;;  %v3409_v25 = vld [vmem:[#allocation13_spill] sm:$0xff] }
  0x83   :  { %1862 = vmatpush.msk.msra.mxu3 %vm802_vm4, %v2049_v6  ;;  %1814 = vmatpush.msk.msra.mxu0 %vm754_vm5, %v2049_v6  ;;  %vm767_vm4 = vcmp.eq.f32.partialorder %v2605_v26, %v2812_v17  ;;  %vm1039_vm5 = vcmp.eq.f32.partialorder %v2119_v29, %v3005_v16  ;;  %v3410_v29 = vld [vmem:[#allocation7_spill] sm:$0xff] }
  0x84   :  { %1830 = vmatpush.msk.msra.mxu1 %vm770_vm6, %v2049_v6  ;;  %1848 = vmatpush.msk.msra.mxu2 %vm784_vm7, %v2049_v6  ;;  %vm1055_vm6 = vcmp.eq.f32.partialorder %v2123_v33, %v3005_v16  ;;  %vm1069_vm7 = vcmp.eq.f32.partialorder %v2125_v34, %v3005_v16  ;;  %v3411_v33 = vld [vmem:[#allocation15_spill] sm:$0xff]  ;;  %v3412_v34 = vld [vmem:[#allocation22_spill] sm:$0xff] }
  0x85   :  { %1863 = vmatpush.msk.msra.mxu3 %vm801_vm8, %v2049_v6  ;;  %1815 = vmatpush.msk.msra.mxu0 %vm753_vm9, %v2049_v6  ;;  %vm1086_vm8 = vcmp.eq.f32.partialorder %v2127_v35, %v3005_v16  ;;  %vm1038_vm9 = vcmp.eq.f32.partialorder %v2129_v37, %v3005_v16  ;;  %v3413_v35 = vld [vmem:[#allocation20_spill] sm:$0xff]  ;;  %v3414_v37 = vld [vmem:[#allocation21_spill] sm:$0xff] }
  0x86   :  { %1831 = vmatpush.msk.msra.mxu1 %vm769_vm10, %v2049_v6  ;;  %1849 = vmatpush.msk.msra.mxu2 %vm783_vm11, %v2049_v6  ;;  %vm1054_vm10 = vcmp.eq.f32.partialorder %v2132_v40, %v3005_v16  ;;  %vm1068_vm11 = vcmp.eq.f32.partialorder %v2134_v41, %v3005_v16 }
  0x87   :  { %1864 = vmatpush.msk.msra.mxu3 %vm800_vm12, %v2049_v6  ;;  %1816 = vmatpush.msk.msra.mxu0 %vm752_vm14, %v2049_v6  ;;  %vm1085_vm12 = vcmp.eq.f32.partialorder %v2137_v43, %v3005_v16  ;;  %vm1053_vm14 = vcmp.eq.f32.partialorder %v2146_v52, %v3005_v16 }
  0x88   :  { %1962 = vmatpush.msk.msrb.mxu2 %vm1071_vm13, %v2049_v6  ;;  %1832 = vmatpush.msk.msra.mxu1 %vm768_vm15, %v2049_v6  ;;  %vm1037_vm13 = vcmp.eq.f32.partialorder %v2139_v44, %v3005_v16  ;;  %vm1067_vm15 = vcmp.eq.f32.partialorder %v2153_v59, %v3005_v16 }
  0x89   :  { %1865 = vmatpush.msk.msra.mxu3 %vm799_vm0, %v2049_v6  ;;  %1817 = vmatpush.msk.msra.mxu0 %vm751_vm3, %v2049_v6  ;;  %vm1084_vm0 = vcmp.eq.f32.partialorder %v2155_v60, %v3005_v16  ;;  %vm1066_vm3 = vcmp.eq.f32.partialorder %v2162_v1, %v3005_v16 }
  0x8a   :  { %1963 = vmatpush.msk.msrb.mxu2 %vm1070_vm1, %v2049_v6  ;;  %1833 = vmatpush.msk.msra.mxu1 %vm767_vm4, %v2049_v6  ;;  %vm1036_vm1 = vcmp.eq.f32.partialorder %v2157_v61, %v3005_v16  ;;  %vm1083_vm4 = vcmp.eq.f32.partialorder %v2164_v2, %v3005_v16 }
  0x8b   :  { %1978 = vmatpush.msk.msrb.mxu3 %vm1087_vm2, %v2049_v6  ;;  %1930 = vmatpush.msk.msrb.mxu0 %vm1039_vm5, %v2049_v6  ;;  %vm1052_vm2 = vcmp.eq.f32.partialorder %v2160_v0, %v3005_v16  ;;  %vm1035_vm5 = vcmp.eq.f32.partialorder %v2166_v4, %v3005_v16 }
  0x8c   :  { %1946 = vmatpush.msk.msrb.mxu1 %vm1055_vm6, %v2049_v6  ;;  %1964 = vmatpush.msk.msrb.mxu2 %vm1069_vm7, %v2049_v6  ;;  %vm1051_vm6 = vcmp.eq.f32.partialorder %v2168_v5, %v3005_v16  ;;  %vm1065_vm7 = vcmp.eq.f32.partialorder %v2174_v9, %v3005_v16 }
  0x8d   :  { %1979 = vmatpush.msk.msrb.mxu3 %vm1086_vm8, %v2049_v6  ;;  %1931 = vmatpush.msk.msrb.mxu0 %vm1038_vm9, %v2049_v6  ;;  %vm1082_vm8 = vcmp.eq.f32.partialorder %v2176_v10, %v3005_v16  ;;  %vm1034_vm9 = vcmp.eq.f32.partialorder %v2178_v11, %v3005_v16 }
  0x8e   :  { %1947 = vmatpush.msk.msrb.mxu1 %vm1054_vm10, %v2049_v6  ;;  %1965 = vmatpush.msk.msrb.mxu2 %vm1068_vm11, %v2049_v6  ;;  %vm1050_vm10 = vcmp.eq.f32.partialorder %v2180_v13, %v3005_v16  ;;  %vm1064_vm11 = vcmp.eq.f32.partialorder %v2188_v20, %v3005_v16 }
  0x8f   :  { %1980 = vmatpush.msk.msrb.mxu3 %vm1085_vm12, %v2049_v6  ;;  %1932 = vmatpush.msk.msrb.mxu0 %vm1037_vm13, %v2049_v6  ;;  %vm1081_vm12 = vcmp.eq.f32.partialorder %v2190_v21, %v3005_v16  ;;  %vm1033_vm13 = vcmp.eq.f32.partialorder %v2198_v32, %v3005_v16 }
  0x90   :  { %1948 = vmatpush.msk.msrb.mxu1 %vm1053_vm14, %v2049_v6  ;;  %1966 = vmatpush.msk.msrb.mxu2 %vm1067_vm15, %v2049_v6  ;;  %vm1049_vm14 = vcmp.eq.f32.partialorder %v2200_v36, %v3005_v16  ;;  %vm1063_vm15 = vcmp.eq.f32.partialorder %v2205_v46, %v3005_v16 }
  0x91   :  { %1981 = vmatpush.msk.msrb.mxu3 %vm1084_vm0, %v2049_v6  ;;  %1933 = vmatpush.msk.msrb.mxu0 %vm1036_vm1, %v2049_v6  ;;  %vm1080_vm0 = vcmp.eq.f32.partialorder %v2207_v47, %v3005_v16  ;;  %vm1032_vm1 = vcmp.eq.f32.partialorder %v2209_v48, %v3005_v16 }
  0x92   :  { %1949 = vmatpush.msk.msrb.mxu1 %vm1052_vm2, %v2049_v6  ;;  %1967 = vmatpush.msk.msrb.mxu2 %vm1066_vm3, %v2049_v6  ;;  %vm1048_vm2 = vcmp.eq.f32.partialorder %v2211_v49, %v3005_v16  ;;  %vm1062_vm3 = vcmp.eq.f32.partialorder %v2217_v54, %v3005_v16 }
  0x93   :  { %1982 = vmatpush.msk.msrb.mxu3 %vm1083_vm4, %v2049_v6  ;;  %1934 = vmatpush.msk.msrb.mxu0 %vm1035_vm5, %v2049_v6  ;;  %vm1079_vm4 = vcmp.eq.f32.partialorder %v2219_v55, %v3005_v16  ;;  %vm1031_vm5 = vcmp.eq.f32.partialorder %v2222_v57, %v3005_v16 }
  0x94   :  { %1950 = vmatpush.msk.msrb.mxu1 %vm1051_vm6, %v2049_v6  ;;  %1968 = vmatpush.msk.msrb.mxu2 %vm1065_vm7, %v2049_v6  ;;  %vm1047_vm6 = vcmp.eq.f32.partialorder %v2224_v58, %v3005_v16  ;;  %vm1061_vm7 = vcmp.eq.f32.partialorder %v2242_v7, %v3005_v16  ;;  %v3415_v7 = vld [vmem:[#allocation5_spill] sm:$0xff] }
  0x95   :  { %1983 = vmatpush.msk.msrb.mxu3 %vm1082_vm8, %v2049_v6  ;;  %1935 = vmatpush.msk.msrb.mxu0 %vm1034_vm9, %v2049_v6  ;;  %vm1078_vm8 = vcmp.eq.f32.partialorder %v3389_v3, %v3005_v16  ;;  %vm1030_vm9 = vcmp.eq.f32.partialorder %v3399_v12, %v3005_v16 }
  0x96   :  { %1951 = vmatpush.msk.msrb.mxu1 %vm1050_vm10, %v2049_v6  ;;  %1969 = vmatpush.msk.msrb.mxu2 %vm1064_vm11, %v2049_v6  ;;  %vm1046_vm10 = vcmp.eq.f32.partialorder %v3400_v30, %v3005_v16  ;;  %vm1060_vm11 = vcmp.eq.f32.partialorder %v3407_v22, %v3005_v16 }
  0x97   :  { %1984 = vmatpush.msk.msrb.mxu3 %vm1081_vm12, %v2049_v6  ;;  %1936 = vmatpush.msk.msrb.mxu0 %vm1033_vm13, %v2049_v6  ;;  %vm1077_vm12 = vcmp.eq.f32.partialorder %v3408_v24, %v3005_v16  ;;  %vm1029_vm13 = vcmp.eq.f32.partialorder %v3402_v31, %v3005_v16 }
  0x98   :  { %1952 = vmatpush.msk.msrb.mxu1 %vm1049_vm14, %v2049_v6  ;;  %1970 = vmatpush.msk.msrb.mxu2 %vm1063_vm15, %v2049_v6  ;;  %vm1045_vm14 = vcmp.eq.f32.partialorder %v3409_v25, %v3005_v16  ;;  %vm1059_vm15 = vcmp.eq.f32.partialorder %v2340_v39, %v3005_v16  ;;  %v2059_v39 = vmov 0  }
  0x99   :  { %1985 = vmatpush.msk.msrb.mxu3 %vm1080_vm0, %v2049_v6  ;;  %1937 = vmatpush.msk.msrb.mxu0 %vm1032_vm1, %v2049_v6  ;;  %vm1076_vm0 = vcmp.eq.f32.partialorder %v3404_v23, %v3005_v16  ;;  %vm1028_vm1 = vcmp.eq.f32.partialorder %v3411_v33, %v3005_v16  ;;  %v1380_v23 = vld [vmem:[%s3329_s2] sm:$0xff] }
  0x9a   :  { %1953 = vmatpush.msk.msrb.mxu1 %vm1048_vm2, %v2049_v6  ;;  %1971 = vmatpush.msk.msrb.mxu2 %vm1062_vm3, %v2049_v6  ;;  %vm1044_vm2 = vcmp.eq.f32.partialorder %v3396_v62, %v3005_v16  ;;  %vm1058_vm3 = vcmp.eq.f32.partialorder %v3406_v15, %v3005_v16 }
  0x9b   :  { %1986 = vmatpush.msk.msrb.mxu3 %vm1079_vm4, %v2049_v6  ;;  %1938 = vmatpush.msk.msrb.mxu0 %vm1031_vm5, %v2049_v6  ;;  %vm1075_vm4 = vcmp.eq.f32.partialorder %v3397_v45, %v3005_v16  ;;  %vm1027_vm5 = vcmp.eq.f32.partialorder %v3398_v28, %v3005_v16  ;;  %v2058_v28 = vmov 0.0  }
  0x9c   :  { %1954 = vmatpush.msk.msrb.mxu1 %vm1047_vm6, %v2049_v6  ;;  %1972 = vmatpush.msk.msrb.mxu2 %vm1061_vm7, %v2049_v6  ;;  %vm1043_vm6 = vcmp.eq.f32.partialorder %v2445_v42, %v3005_v16  ;;  %vm1057_vm7 = vcmp.eq.f32.partialorder %v2447_v50, %v3005_v16 }
  0x9d   :  { %1987 = vmatpush.msk.msrb.mxu3 %vm1078_vm8, %v2049_v6  ;;  %1939 = vmatpush.msk.msrb.mxu0 %vm1030_vm9, %v2049_v6  ;;  %vm1074_vm8 = vcmp.eq.f32.partialorder %v2478_v63, %v3005_v16  ;;  %vm1026_vm9 = vcmp.eq.f32.partialorder %v2521_v18, %v3005_v16  ;;  %v1387_v18 = vld [vmem:[%s3330_s3] sm:$0xff] }
  0x9e   :  { %1955 = vmatpush.msk.msrb.mxu1 %vm1046_vm10, %v2049_v6  ;;  %1973 = vmatpush.msk.msrb.mxu2 %vm1060_vm11, %v2049_v6  ;;  %vm1042_vm10 = vcmp.eq.f32.partialorder %v2523_v14, %v3005_v16  ;;  %vm1056_vm11 = vcmp.eq.f32.partialorder %v2568_v19, %v3005_v16  ;;  %v3416_v14 = vld [vmem:[#allocation6_spill] sm:$0xff] }
  0x9f   :  { %1988 = vmatpush.msk.msrb.mxu3 %vm1077_vm12, %v2049_v6  ;;  %999 = vmatmul.f32.vlgmr.msra.gmra.mxu2 %v3410_v29  ;;  %vm1073_vm12 = vcmp.eq.f32.partialorder %v2537_v56, %v3005_v16 }
  0xa0   :  { %1940 = vmatpush.msk.msrb.mxu0 %vm1029_vm13, %v2049_v6  ;;  %1956 = vmatpush.msk.msrb.mxu1 %vm1045_vm14, %v2049_v6  ;;  %vm1025_vm13 = vcmp.eq.f32.partialorder %v2552_v27, %v3005_v16  ;;  %vm1041_vm14 = vcmp.eq.f32.partialorder %v2554_v38, %v3005_v16 }
  0xa1   :  { %1974 = vmatpush.msk.msrb.mxu2 %vm1059_vm15, %v2049_v6  ;;  %1989 = vmatpush.msk.msrb.mxu3 %vm1076_vm0, %v2049_v6  ;;  %vm1072_vm15 = vcmp.eq.f32.partialorder %v2570_v8, %v3005_v16  ;;  %vm1024_vm0 = vcmp.eq.f32.partialorder %v2603_v51, %v3005_v16 }
  0xa2   :  { %1019 = vmatmul.f32.vlgmr.msra.gmra.mxu3 %v3412_v34  ;;  %1941 = vmatpush.msk.msrb.mxu0 %vm1028_vm1, %v2049_v6  ;;  %vm1040_vm1 = vcmp.eq.f32.partialorder %v2605_v26, %v3005_v16 }
  0xa3   :  { %1957 = vmatpush.msk.msrb.mxu1 %vm1044_vm2, %v2049_v6  ;;  %1975 = vmatpush.msk.msrb.mxu2 %vm1058_vm3, %v2049_v6  ;;  %vm1301_vm2 = vcmp.le.f32.partialorder %v3415_v7, 6.0  ;;  %vm1307_vm3 = vcmp.le.f32.partialorder %v3416_v14, 6.0 }
  0xa4   :  { %1990 = vmatpush.msk.msrb.mxu3 %vm1075_vm4, %v2049_v6  ;;  %959 = vmatmul.f32.vlgmr.msra.gmra.mxu0 %v3413_v35  ;;  %v3265_v31 = vsel %vm1301_vm2, 1.0, %v2058_v28  ;;  %v3267_v38 = vsel %vm1307_vm3, 1.0, %v2058_v28  ;;  %vm1304_vm4 = vcmp.ge.f32.partialorder %v3416_v14, 1.0 }
  0xa5   :  { %979 = vmatmul.f32.vlgmr.msra.gmra.mxu1 %v3414_v37  ;;  %1942 = vmatpush.msk.msrb.mxu0 %vm1027_vm5, %v2049_v6  ;;  %v3271_v45 = vmul.f32 %v3267_v38, %v3265_v31  ;;  %vm1363_vm5 = vcmask 1041408   ;;  %v3275_v50 = vsel %vm1304_vm4, 1.0, %v2058_v28 }
  0xa6   :  { %1958 = vmatpush.msk.msrb.mxu1 %vm1043_vm6, %v2049_v6  ;;  %1976 = vmatpush.msk.msrb.mxu2 %vm1057_vm7, %v2049_v6  ;;  %v3279_v56 = vmul.f32 %v3275_v50, %v3265_v31  ;;  %vm1298_vm6 = vcmp.ge.f32.partialorder %v3415_v7, 1.0  ;;  %vm1350_vm7 = vcmask 1043456  }
  0xa7   :  { %1991 = vmatpush.msk.msrb.mxu3 %vm1074_vm8, %v2049_v6  ;;  %1943 = vmatpush.msk.msrb.mxu0 %vm1026_vm9, %v2049_v6  ;;  %v3285_v62 = vsel %vm1298_vm6, 1.0, %v2058_v28  ;;  %vm1359_vm8 = vcmask 293888  }
  0xa8   :  { %1959 = vmatpush.msk.msrb.mxu1 %vm1042_vm10, %v2049_v6  ;;  %1977 = vmatpush.msk.msrb.mxu2 %vm1056_vm11, %v2049_v6  ;;  %v1311_v25 = vmul.f32 %v3267_v38, %v3285_v62  ;;  %vm1427_vm10 = vcmask 588800  }
  0xa9   :  { %1992 = vmatpush.msk.msrb.mxu3 %vm1073_vm12, %v2049_v6  ;;  %1272 = vmatmul.f32.vlgmr.msrb.gmra.mxu2 %v3410_v29 }
  0xaa   :  { %1944 = vmatpush.msk.msrb.mxu0 %vm1025_vm13, %v2049_v6  ;;  %1960 = vmatpush.msk.msrb.mxu1 %vm1041_vm14, %v2049_v6 }
  0xab   :  { %1993 = vmatpush.msk.msrb.mxu3 %vm1072_vm15, %v2049_v6  ;;  %2015 = vset.pattern.permute.xlu0 %v2059_v39 }
  0xac   :  { %1292 = vmatmul.f32.vlgmr.msrb.gmra.mxu3 %v3412_v34  ;;  %1945 = vmatpush.msk.msrb.mxu0 %vm1024_vm0, %v2049_v6 }
  0xad   :  { %1961 = vmatpush.msk.msrb.mxu1 %vm1040_vm1, %v2049_v6  ;;  %1232 = vmatmul.f32.vlgmr.msrb.gmra.mxu0 %v3413_v35  ;;  %v1310_v35 = vmul.f32 %v3275_v50, %v3285_v62 }
  0xae   :  { %1252 = vmatmul.f32.vlgmr.msrb.gmra.mxu1 %v3414_v37  ;;  %2014 = vset.pattern.permute.xlu2 %v2059_v39 }
  0xaf   :  { %2016 = vset.pattern.permute.xlu1 %v2059_v39 }
  0xdd   :  { %v413_v40 = vpop.f32.mrf.mxu0 }
  0xde   :  { %v433_v41 = vpop.f32.mrf.mxu1  ;;  %v453_v43 = vpop.f32.mrf.mxu2 }
  0xdf   :  { %v434_v5 = vadd.f32 %v433_v41, %v413_v40 }
  0xe1   :  { %v473_v44 = vpop.f32.mrf.mxu3  ;;  %v454_v11 = vadd.f32 %v453_v43, %v434_v5 }
  0xe3   :  { %v474_v47 = vadd.f32 %v473_v44, %v454_v11 }
  0xe7   :  { %v686_v52 = vpop.f32.mrf.mxu0 }
  0xe8   :  { %v706_v59 = vpop.f32.mrf.mxu1  ;;  %v726_v60 = vpop.f32.mrf.mxu2 }
  0xe9   :  { %v707_v9 = vadd.f32 %v706_v59, %v686_v52 }
  0xeb   :  { %v746_v61 = vpop.f32.mrf.mxu3  ;;  %v727_v13 = vadd.f32 %v726_v60, %v707_v9 }
  0xed   :  { %v747_v48 = vadd.f32 %v746_v61, %v727_v13 }
  0xef   :  { %v749_v57 = vmax.f32 %v474_v47, %v747_v48 }
 0x121   :  { %v960_v0 = vpop.f32.mrf.mxu0 }
 0x122   :  { %v980_v1 = vpop.f32.mrf.mxu1  ;;  %v1000_v2 = vpop.f32.mrf.mxu2 }
 0x123   :  { %v981_v10 = vadd.f32 %v980_v1, %v960_v0  ;;  %v1358_v1 = vld [vmem:[%s3328_s1] sm:$0xf] }
 0x125   :  { %v1020_v4 = vpop.f32.mrf.mxu3  ;;  %v1001_v32 = vadd.f32 %v1000_v2, %v981_v10 }
 0x127   :  { %v1021_v54 = vadd.f32 %v1020_v4, %v1001_v32  ;;  %v1447_v32 = vld [vmem:[%s3332_s5] sm:$0xff] }
 0x12a   :  { %v1233_v20 = vpop.f32.mrf.mxu0 }
 0x12b   :  { %v1253_v21 = vpop.f32.mrf.mxu1 }
 0x12c   :  { %v1254_v36 = vadd.f32 %v1253_v21, %v1233_v20  ;;  %v1273_v46 = vpop.f32.mrf.mxu2  ;;  %v1454_v21 = vld [vmem:[%s3333_s6] sm:$0xff] }
 0x12e   :  { %v1274_v49 = vadd.f32 %v1273_v46, %v1254_v36 }
 0x12f   :  { %v1293_v53 = vpop.f32.mrf.mxu3 }
 0x130   :  { %v1294_v55 = vadd.f32 %v1293_v53, %v1274_v49 }
 0x132   :  { %v1296_v58 = vmax.f32 %v1021_v54, %v1294_v55 }
 0x134   :  { %v1297_v6 = vmax.f32 %v749_v57, %v1296_v58 }
 0x136   :  { %1317 = vrot.lane.b32.xlu2 %v1297_v6, %s2050_s0  ;;  %1332 = vrot.lane.b32.xlu1 %v1297_v6, %s2051_s28 }
 0x137   :  { %1335 = vrot.lane.b32.xlu0 %v1297_v6, %s2052_s29 }
 0x13e   :  { %1323 = vrot.lane.b32.xlu2 %v1297_v6, %s2053_s30  ;;  %1329 = vrot.lane.b32.xlu1 %v1297_v6, %s2054_s8 }
 0x13f   :  { %1326 = vrot.lane.b32.xlu0 %v1297_v6, %s2055_s9 }
 0x146   :  { %1320 = vrot.lane.b32.xlu1 %v1297_v6, %s2056_s10  ;;  %1383 = vperm.xlu2 %2014, %v1380_v23  }
 0x147   :  { %1314 = vrot.lane.b32.xlu0 %v1297_v6, %s2057_s11 }
 0x14f   :  { %1390 = vperm.xlu0 %2015, %v1387_v18  }
 0x190   :  { %v1318_v16 = vpop.permute.xlu2 %1317 }
 0x191   :  { %v1319_v29 = vmul.f32 %v3285_v62, %v1318_v16 }
 0x193   :  { %v1339_v52 = vrot.slane %v1319_v29, 4 }
 0x198   :  { %v1324_v51 = vpop.permute.xlu2 %1323 }
 0x199   :  { %v1325_v24 = vmul.f32 %v3275_v50, %v1324_v51 }
 0x19b   :  { %v1342_v41 = vrot.slane %v1325_v24, 4 }
 0x1a0   :  { %v1384_v2 = vpop.permute.xlu2 %1383 }
 0x1a8   :  { %v1333_v17 = vpop.permute.xlu1 %1332 }
 0x1a9   :  { %v1336_v26 = vpop.permute.xlu0 %1335  ;;  %v1334_v27 = vmul.f32 %v3265_v31, %v1333_v17 }
 0x1aa   :  { %v1337_v30 = vmul.f32 %v1336_v26, %v3271_v45 }
 0x1ab   :  { %v1348_v12 = vrot.slane %v1334_v27, 4 }
 0x1ac   :  { %v1357_v42 = vpack.c.bf16 %v1337_v30, %v1337_v30 }
 0x1ae   :  { %v1365_v63 = vsel %vm1363_vm5, %v1357_v42, 0 }
 0x1af   :  { %1372 = vmatpush.bf16.msra.mxu0 %v1365_v63 }
 0x1b0   :  { %v1330_v19 = vpop.permute.xlu1 %1329 }
 0x1b1   :  { %v1327_v8 = vpop.permute.xlu0 %1326  ;;  %v1331_v3 = vmul.f32 %v1330_v19, %v3279_v56 }
 0x1b2   :  { %v1328_v15 = vmul.f32 %v3267_v38, %v1327_v8 }
 0x1b3   :  { %v1354_v34 = vsel %vm1350_vm7, %v1331_v3, %v1348_v12 }
 0x1b4   :  { %v1345_v22 = vrot.slane %v1328_v15, 4 }
 0x1b6   :  { %v1353_v33 = vsel %vm1350_vm7, %v1297_v6, %v1345_v22 }
 0x1b7   :  { %v1356_v37 = vpack.c.bf16 %v1354_v34, %v1353_v33 }
 0x1b8   :  { %v1321_v40 = vpop.permute.xlu1 %1320 }
 0x1b9   :  { %v1322_v43 = vmul.f32 %v1321_v40, %v1311_v25  ;;  %1373 = vmatpush.bf16.msra.mxu0 %v1356_v37  ;;  %v1315_v44 = vpop.permute.xlu0 %1314 }
 0x1ba   :  { %v1316_v59 = vmul.f32 %v1315_v44, %v1310_v35 }
 0x1bb   :  { %v1352_v60 = vsel %vm1350_vm7, %v1322_v43, %v1342_v41 }
 0x1bc   :  { %v1351_v61 = vsel %vm1350_vm7, %v1316_v59, %v1339_v52 }
 0x1bd   :  { %v1355_v0 = vpack.c.bf16 %v1352_v60, %v1351_v61 }
 0x1bf   :  { %1374 = vmatpush.bf16.msra.mxu0 %v1355_v0 }
 0x1c1   :  { %v1391_v5 = vpop.permute.xlu0 %1390 }
 0x1c2   :  { %1998 = vmatmul.msk.bf16.vlgmr.msra.gmra.mxu0 %vm1359_vm8, %v1358_v1 }
 0x23f   :  { %v1376_v4 = vpop.f32.mrf.mxu0 }
 0x240   :  { %v1386_v9 = vmul.f32 %v1384_v2, %v1376_v4 }
 0x242   :  { %v1393_v10 = vadd.f32 %v1391_v5, %v1386_v9 }
 0x244   :  { %vm1394_vm9 = vcmp.ge.f32.partialorder %v1393_v10, 0.0  ;;  %v1395_v11 = vmul.f32 0.01, %v1393_v10 }
 0x246   :  { %v1396_v13 = vsel %vm1394_vm9, %v1393_v10, %v1395_v11 }
 0x247   :  { %v1378_v20 = vpop.f32.mrf.mxu0  ;;  %1403 = vrot.lane.b32.xlu0 %v1396_v13, %s2056_s10  ;;  %1412 = vrot.lane.b32.xlu2 %v1396_v13, %s2054_s8 }
 0x248   :  { %1418 = vrot.lane.b32.xlu1 %v1396_v13, %s2052_s29 }
 0x24f   :  { %1400 = vrot.lane.b32.xlu0 %v1396_v13, %s2050_s0  ;;  %1409 = vrot.lane.b32.xlu2 %v1396_v13, %s2055_s9 }
 0x250   :  { %1415 = vrot.lane.b32.xlu1 %v1396_v13, %s2051_s28 }
 0x257   :  { %1397 = vrot.lane.b32.xlu2 %v1396_v13, %s2057_s11 }
 0x258   :  { %1406 = vrot.lane.b32.xlu1 %v1396_v13, %s2053_s30 }
 0x25f   :  { %1457 = vperm.xlu2 %2014, %v1454_v21  }
 0x260   :  { %1450 = vperm.xlu1 %2016, %v1447_v32  }
 0x2a1   :  { %v1413_v36 = vpop.permute.xlu2 %1412 }
 0x2a2   :  { %v1414_v57 = vmul.f32 %v1413_v36, %v3279_v56 }
 0x2a9   :  { %v1410_v54 = vpop.permute.xlu2 %1409 }
 0x2aa   :  { %v1411_v6 = vmul.f32 %v3267_v38, %v1410_v54 }
 0x2ac   :  { %v1423_v14 = vpack.c.bf16 %v1411_v6, %v1396_v13 }
 0x2b9   :  { %v1404_v53 = vpop.permute.xlu0 %1403 }
 0x2ba   :  { %v1419_v46 = vpop.permute.xlu1 %1418  ;;  %v1405_v28 = vmul.f32 %v1404_v53, %v1311_v25 }
 0x2bb   :  { %v1420_v47 = vmul.f32 %v1419_v46, %v3271_v45  ;;  %v1398_v45 = vpop.permute.xlu2 %1397 }
 0x2bc   :  { %v1399_v26 = vmul.f32 %v1398_v45, %v1310_v35 }
 0x2bd   :  { %v1425_v48 = vpack.c.bf16 %v1420_v47, %v1420_v47 }
 0x2bf   :  { %v1432_v49 = vsel %vm1350_vm7, %v1425_v48, 0 }
 0x2c0   :  { %1437 = vmatpush.bf16.msra.mxu1 %v1432_v49 }
 0x2c1   :  { %v1401_v18 = vpop.permute.xlu0 %1400 }
 0x2c2   :  { %v1416_v55 = vpop.permute.xlu1 %1415  ;;  %v1402_v16 = vmul.f32 %v3285_v62, %v1401_v18 }
 0x2c3   :  { %v1417_v58 = vmul.f32 %v3265_v31, %v1416_v55  ;;  %v1426_v31 = vld [vmem:[%s3331_s4] sm:$0xf]  ;;  %v1458_v56 = vpop.permute.xlu2 %1457 }
 0x2c4   :  { %v1421_v30 = vpack.c.bf16 %v1402_v16, %v1399_v26 }
 0x2c5   :  { %v1424_v7 = vpack.c.bf16 %v1417_v58, %v1414_v57 }
 0x2c7   :  { %1438 = vmatpush.bf16.msra.mxu1 %v1424_v7 }
 0x2ca   :  { %v1407_v23 = vpop.permute.xlu1 %1406 }
 0x2cb   :  { %v1408_v39 = vmul.f32 %v3275_v50, %v1407_v23  ;;  %1439 = vmatpush.bf16.msra.mxu1 %v1423_v14 }
 0x2cd   :  { %v1422_v17 = vpack.c.bf16 %v1408_v39, %v1405_v28 }
 0x2cf   :  { %1440 = vmatpush.bf16.msra.mxu1 %v1422_v17 }
 0x2d2   :  { %v1451_v38 = vpop.permute.xlu1 %1450 }
 0x2d3   :  { %1441 = vmatpush.bf16.msra.mxu1 %v1421_v30 }
 0x2d6   :  { %1999 = vmatmul.msk.bf16.vlgmr.msra.gmra.mxu1 %vm1427_vm10, %v1426_v31 }
 0x353   :  { %v1443_v42 = vpop.f32.mrf.mxu1 }
 0x354   :  { %v1453_v63 = vmul.f32 %v1451_v38, %v1443_v42 }
 0x356   :  { %v1460_v50 = vadd.f32 %v1458_v56, %v1453_v63 }
 0x358   :  { %v1462_v27 = vmul.f32 0.01, %v1460_v50  ;;  %vm1461_vm11 = vcmp.ge.f32.partialorder %v1460_v50, 0.0 }
 0x35a   :  { %v1463_v19 = vsel %vm1461_vm11, %v1460_v50, %v1462_v27 }
 0x35b   :  { %v1445_v8 = vpop.f32.mrf.mxu1  ;;  %1464 = vst [vmem:[#allocation2] sm:$0xff] %v1463_v19 }
 0x35c   :  { %1475 = dma.vmem_to_hbm [thread:$0]  %s1471_s20, 128, %s1473_s23, [#allocation3]  }
 0x35d   :  { %2045 = dma.done.wait [#allocation3], 128  }
 0x35e   :  { %2046 = vsyncadd [#allocation3], 4294967168 }
 0x35f   :  { %1480 = vsyncpa [#allocation3], 1 }

</bundles_post_ra>
